<compile_context>
chip_gen: v5e
topology: v5e:2x2
jax: 0.10.0
libtpu: 0.0.40
codegen_flags: <defaults>
</compile_context>

<pallas_src>
import functools

import jax
import jax.numpy as jnp
from jax.experimental import pallas as pl
from jax.experimental.pallas import tpu as pltpu


# ------------------------------ fused kernel --------------------------------

def _decoder_kernel(d_ref, a_ref, c0_ref,
                    lt3_ref, w1_ref, b1_ref, ut3_ref,
                    lt2_ref, w2_ref, b2_ref, ut2_ref,
                    lt1_ref, w3_ref, b3_ref, ut1_ref,
                    lt0_ref, w4_ref, b4_ref,
                    o_ref, *, n_lat, cheb_k):
    """Whole decoder forward, channels-major layout (features = (C, N)).

    d_ref   : SMEM (B*8,)          flattened latent code
    a_ref   : VMEM (B*8, 32, n3)   folded fc + view + upscale(4) operator
    c0_ref  : VMEM (32, n3)        folded fc bias pushed through upscale(4)
    lt*_ref : VMEM (N, N)          L_hat^T per mesh level
    w*_ref  : VMEM (Cout, K*Cin)   K-fused ChebConv weights (transposed)
    b*_ref  : VMEM (Cout, 1)       ChebConv bias as a column
    ut*_ref : VMEM (N_in, N_out)   upsampling matrices (transposed)
    o_ref   : VMEM (3, n0)         output (transposed; wrapper transposes back)
    """
    f32 = jnp.float32

    # -- Stage 0: fc_dec + view(-1, 32) + upscale(4), folded into (A, c0). ---
    x = c0_ref[...]                               # (32, n3)
    for k in range(n_lat):                        # static unroll, n_lat = B*8
        x = x + d_ref[k] * a_ref[k]

    # -- ChebConv block: T_k recurrence + single fused weight contraction. ---
    def cheb(lt_ref, w_ref, b_ref, x, relu):
        lt = lt_ref[...]                          # (N, N) = L_hat^T
        t_prev = x                                # T_0^T        (Cin, N)
        t_cur = jnp.dot(x, lt, preferred_element_type=f32)        # T_1^T
        ts = [t_prev, t_cur]
        for _ in range(2, cheb_k):
            t_next = (2.0 * jnp.dot(t_cur, lt, preferred_element_type=f32)
                      - t_prev)
            ts.append(t_next)
            t_prev, t_cur = t_cur, t_next
        t_cat = jnp.concatenate(ts, axis=0)       # (K*Cin, N), sublane concat
        out = jnp.dot(w_ref[...], t_cat, preferred_element_type=f32)
        out = out + b_ref[...]                    # (Cout, 1) lane-broadcast
        if relu:
            out = jnp.maximum(out, 0.0)
        return out                                # (Cout, N)

    x = cheb(lt3_ref, w1_ref, b1_ref, x, relu=True)               # (32, n3)
    x = jnp.dot(x, ut3_ref[...], preferred_element_type=f32)      # (32, n2)
    x = cheb(lt2_ref, w2_ref, b2_ref, x, relu=True)               # (16, n2)
    x = jnp.dot(x, ut2_ref[...], preferred_element_type=f32)      # (16, n1)
    x = cheb(lt1_ref, w3_ref, b3_ref, x, relu=True)               # (16, n1)
    x = jnp.dot(x, ut1_ref[...], preferred_element_type=f32)      # (16, n0)
    x = cheb(lt0_ref, w4_ref, b4_ref, x, relu=False)              # (3,  n0)

    o_ref[...] = x


_OP_ORDER = ("a", "c0",
             "lt3", "w1", "b1", "ut3",
             "lt2", "w2", "b2", "ut2",
             "lt1", "w3", "b3", "ut1",
             "lt0", "w4", "b4")


def _decoder_flop_estimate(ops, n_lat, cheb_k):
    def mm(m, k, n):
        return 2 * m * k * n
    flops = 2 * n_lat * ops["c0"].size            # folded fc/view/upscale(4)
    for lt_key, w_key in (("lt3", "w1"), ("lt2", "w2"),
                          ("lt1", "w3"), ("lt0", "w4")):
        n = ops[lt_key].shape[0]
        cout, kcin = ops[w_key].shape
        cin = kcin // cheb_k
        flops += (cheb_k - 1) * mm(cin, n, n) + mm(cout, kcin, n)
    for u_key, ch in (("ut3", 32), ("ut2", 16), ("ut1", 16)):
        nin, nout = ops[u_key].shape
        flops += mm(ch, nin, nout)
    return int(flops)


def decoder_forward(data, ops, *, cheb_k=6):
    """Fused decoder forward.  data: (B, 8) latent -> (n0, 3) vertices."""
    d = data.reshape(-1).astype(jnp.float32)      # (B*8,) SMEM scalars
    n_lat = d.shape[0]
    n0 = ops["lt0"].shape[0]
    cout = ops["w4"].shape[0]                     # 3

    op_list = [ops[k] for k in _OP_ORDER]

    flops = _decoder_flop_estimate(ops, n_lat, cheb_k)
    bytes_accessed = 4 * (int(d.size) + sum(int(o.size) for o in op_list)
                          + cout * n0)

    kernel = functools.partial(_decoder_kernel, n_lat=n_lat, cheb_k=cheb_k)
    vmem = pl.BlockSpec(memory_space=pltpu.MemorySpace.VMEM)
    smem = pl.BlockSpec(memory_space=pltpu.MemorySpace.SMEM)

    # Grid is empty: the whole decoder is one kernel invocation on one TC.
    # (For large batches, add a leading grid axis over batch with
    # dimension_semantics=("parallel",) to use the second TC on v7x.)
    out_t = pl.pallas_call(
        kernel,
        out_shape=jax.ShapeDtypeStruct((cout, n0), jnp.float32),
        in_specs=[smem] + [vmem] * len(op_list),
        out_specs=vmem,
        compiler_params=pltpu.CompilerParams(
            vmem_limit_bytes=8 * 1024 * 1024),
        cost_estimate=pl.CostEstimate(flops=flops, transcendentals=0,
                                      bytes_accessed=bytes_accessed),
    )(d, *op_list)

    # Single tiny transpose back to the caller-facing (N, 3) layout.
    return out_t.T


# ---------------------- one-time operator / weight folding ------------------

def build_decoder_operands(params, mesh, batch):
    """Fold params + mesh operators into the layouts the fused kernel wants.

    This is exact linear algebra (weight preprocessing), done once:
      fc_dec + view(-1, 32) + upscale(4)  ==>  x3^T = c0 + sum_k d[k] * A[k]
      ChebConv weights (K, Cin, Cout)     ==>  (Cout, K*Cin)
      operators L, U                      ==>  L^T, U^T  (channels-major path)
    """
    f32 = jnp.float32
    hi = jax.lax.Precision.HIGHEST

    lat_dim, fc_out = params["fc_w"].shape        # (8, 704)
    c_coarse = 32
    nodes_per_b = fc_out // c_coarse              # 22
    n3 = mesh["U4"].shape[0]
    assert mesh["U4"].shape[1] == batch * nodes_per_b

    # A[k=(b*lat_dim+i), f, m] = sum_j U4[m, b*nodes_per_b+j] * fc_w[i, j*32+f]
    w_fc = params["fc_w"].reshape(lat_dim, nodes_per_b, c_coarse)   # [i, j, f]
    u4r = mesh["U4"].reshape(n3, batch, nodes_per_b)                # [m, b, j]
    a_op = jnp.einsum("mbj,ijf->bifm", u4r, w_fc, precision=hi)     # [b,i,f,m]
    a_op = a_op.reshape(batch * lat_dim, c_coarse, n3).astype(f32)  # [k, f, m]

    bias_nodes = jnp.tile(params["fc_b"].reshape(nodes_per_b, c_coarse),
                          (batch, 1))                               # (B*22, 32)
    c0 = jnp.dot(mesh["U4"], bias_nodes, precision=hi).T.astype(f32)  # (32, n3)

    def cheb_w(w):                                # (K, Cin, Cout) -> (Cout, K*Cin)
        kk, cin, cout = w.shape
        return jnp.asarray(w, f32).reshape(kk * cin, cout).T

    def col(b):                                   # (Cout,) -> (Cout, 1)
        return jnp.asarray(b, f32).reshape(-1, 1)

    return {
        "a": a_op, "c0": c0,
        "lt3": mesh["L3"].T, "w1": cheb_w(params["w1"]), "b1": col(params["b1"]),
        "ut3": mesh["U3"].T,
        "lt2": mesh["L2"].T, "w2": cheb_w(params["w2"]), "b2": col(params["b2"]),
        "ut2": mesh["U2"].T,
        "lt1": mesh["L1"].T, "w3": cheb_w(params["w3"]), "b3": col(params["b3"]),
        "ut1": mesh["U1"].T,
        "lt0": mesh["L0"].T, "w4": cheb_w(params["w4"]), "b4": col(params["b4"]),
    }


# ------------------------- pure-JAX reference (spec) ------------------------

def decoder_reference(data, params, mesh):
    """Mirrors the original PyTorch Decoder.forward, in plain JAX."""
    def cheb(L, x, W, b, relu):
        K = W.shape[0]
        t_prev, t_cur = x, L @ x
        acc = t_prev @ W[0] + t_cur @ W[1]
        for k in range(2, K):
            t_next = 2.0 * (L @ t_cur) - t_prev
            acc = acc + t_next @ W[k]
            t_prev, t_cur = t_cur, t_next
        acc = acc + b
        return jnp.maximum(acc, 0.0) if relu else acc

    x = data @ params["fc_w"] + params["fc_b"]
    x = x.reshape(-1, 32)
    x = mesh["U4"] @ x
    x = cheb(mesh["L3"], x, params["w1"], params["b1"], True)
    x = mesh["U3"] @ x
    x = cheb(mesh["L2"], x, params["w2"], params["b2"], True)
    x = mesh["U2"] @ x
    x = cheb(mesh["L1"], x, params["w3"], params["b3"], True)
    x = mesh["U1"] @ x
    x = cheb(mesh["L0"], x, params["w4"], params["b4"], False)
    return x


# ------------------------- synthetic graph hierarchy ------------------------

def ring_edge_index(n):
    """Undirected ring graph on n nodes, both directions (2, 2n)."""
    src = jnp.arange(n, dtype=jnp.int32)
    dst = (src + 1) % n
    return jnp.stack([jnp.concatenate([src, dst]),
                      jnp.concatenate([dst, src])])


def scaled_laplacian(edge_index, num_nodes):
    """Dense L_hat = 2/lambda_max * (I - D^-1/2 A D^-1/2) - I with
    lambda_max = 2 (PyG ChebConv default) == -D^-1/2 A D^-1/2."""
    A = jnp.zeros((num_nodes, num_nodes), jnp.float32)
    A = A.at[edge_index[0], edge_index[1]].add(1.0)
    deg = A.sum(axis=1)
    dinv = jnp.where(deg > 0, 1.0 / jnp.sqrt(deg), 0.0)
    return -(A * dinv[:, None] * dinv[None, :])


def upsample_matrix(n_out, n_in):
    """Deterministic barycentric-style upsampling matrix (n_out, n_in)."""
    rows = jnp.arange(n_out)
    U = jnp.zeros((n_out, n_in), jnp.float32)
    U = U.at[rows, rows % n_in].add(0.7)
    U = U.at[rows, (rows + 1) % n_in].add(0.3)
    return U


# ------------------------------ parameter init ------------------------------

def init_params(key):
    ks = jax.random.split(key, 10)
    s = 0.1

    def cheb_w(k, K, cin, cout):
        return s * jax.random.normal(k, (K, cin, cout), jnp.float32)

    return {
        "fc_w": s * jax.random.normal(ks[0], (8, 704), jnp.float32),
        "fc_b": s * jax.random.normal(ks[1], (704,), jnp.float32),
        "w1": cheb_w(ks[2], 6, 32, 32),
        "b1": s * jax.random.normal(ks[3], (32,), jnp.float32),
        "w2": cheb_w(ks[4], 6, 32, 16),
        "b2": s * jax.random.normal(ks[5], (16,), jnp.float32),
        "w3": cheb_w(ks[6], 6, 16, 16),
        "b3": s * jax.random.normal(ks[7], (16,), jnp.float32),
        "w4": cheb_w(ks[8], 6, 16, 3),
        "b4": s * jax.random.normal(ks[9], (3,), jnp.float32),
    }


# ----------------------------------- main -----------------------------------

if __name__ == "__main__":
    key = jax.random.PRNGKey(0)
    k_data, k_params = jax.random.split(key)

    B = 2
    data = jax.random.normal(k_data, (B, 8), jnp.float32)     # latent code

    params = init_params(k_params)

    # Node counts per mesh level (level 4 is the coarsest: B * 704/32 nodes).
    n4 = B * (704 // 32)   # 44
    n3, n2, n1, n0 = 64, 96, 128, 160

    mesh = {
        "U4": upsample_matrix(n3, n4),
        "U3": upsample_matrix(n2, n3),
        "U2": upsample_matrix(n1, n2),
        "U1": upsample_matrix(n0, n1),
        "L3": scaled_laplacian(ring_edge_index(n3), n3),
        "L2": scaled_laplacian(ring_edge_index(n2), n2),
        "L1": scaled_laplacian(ring_edge_index(n1), n1),
        "L0": scaled_laplacian(ring_edge_index(n0), n0),
    }

    # One-time operator / weight folding (done once, outside the hot path).
    ops = build_decoder_operands(params, mesh, B)
    ops = jax.tree_util.tree_map(jax.block_until_ready, ops)

    fwd = jax.jit(decoder_forward)
    out = jax.block_until_ready(fwd(data, ops))

    assert out.shape == (n0, 3), out.shape
    assert out.dtype == jnp.float32

    # Correctness check against a pure-JAX reference of the PyTorch forward.
    # Tolerance is loose enough to absorb differences in f32 matmul pass
    # strategy (MXU vs. XLA default precision) and accumulation order from the
    # exact algebraic refolding; real bugs would produce O(0.1-1) errors.
    ref = jax.block_until_ready(decoder_reference(data, params, mesh))
    max_err = float(jnp.max(jnp.abs(out - ref)))
    assert jnp.allclose(out, ref, atol=2e-2, rtol=2e-2), max_err

    print("KERNEL_OK")
</pallas_src>

<mosaic_0001>
module attributes {stable_mosaic.version = 11 : i64} {
  func.func @_decoder_kernel(%arg0: memref<16xf32, #tpu.memory_space<smem>>, %arg1: memref<16x32x64xf32, #tpu.memory_space<vmem>>, %arg2: memref<32x64xf32, #tpu.memory_space<vmem>>, %arg3: memref<64x64xf32, #tpu.memory_space<vmem>>, %arg4: memref<32x192xf32, #tpu.memory_space<vmem>>, %arg5: memref<32x1xf32, #tpu.memory_space<vmem>>, %arg6: memref<64x96xf32, #tpu.memory_space<vmem>>, %arg7: memref<96x96xf32, #tpu.memory_space<vmem>>, %arg8: memref<16x192xf32, #tpu.memory_space<vmem>>, %arg9: memref<16x1xf32, #tpu.memory_space<vmem>>, %arg10: memref<96x128xf32, #tpu.memory_space<vmem>>, %arg11: memref<128x128xf32, #tpu.memory_space<vmem>>, %arg12: memref<16x96xf32, #tpu.memory_space<vmem>>, %arg13: memref<16x1xf32, #tpu.memory_space<vmem>>, %arg14: memref<128x160xf32, #tpu.memory_space<vmem>>, %arg15: memref<160x160xf32, #tpu.memory_space<vmem>>, %arg16: memref<3x96xf32, #tpu.memory_space<vmem>>, %arg17: memref<3x1xf32, #tpu.memory_space<vmem>>, %arg18: memref<3x160xf32, #tpu.memory_space<vmem>>) attributes {dimension_semantics = [], scalar_prefetch = 0 : i64, scratch_operands = 0 : i64, tpu.core_type = #tpu.core_type<tc>} {
    %c0 = arith.constant 0 : index
    %c0_0 = arith.constant 0 : index
    %0 = vector.load %arg2[%c0, %c0_0] : memref<32x64xf32, #tpu.memory_space<vmem>>, vector<32x64xf32>
    %c0_1 = arith.constant 0 : index
    %1 = memref.load %arg0[%c0_1] : memref<16xf32, #tpu.memory_space<smem>>
    %c0_2 = arith.constant 0 : index
    %c0_3 = arith.constant 0 : index
    %c0_4 = arith.constant 0 : index
    %2 = vector.load %arg1[%c0_2, %c0_3, %c0_4] : memref<16x32x64xf32, #tpu.memory_space<vmem>>, vector<1x32x64xf32>
    %3 = vector.shape_cast %2 : vector<1x32x64xf32> to vector<32x64xf32>
    %4 = vector.broadcast %1 : f32 to vector<32x64xf32>
    %5 = arith.mulf %4, %3 : vector<32x64xf32>
    %6 = arith.addf %0, %5 : vector<32x64xf32>
    %c1 = arith.constant 1 : index
    %7 = memref.load %arg0[%c1] : memref<16xf32, #tpu.memory_space<smem>>
    %c1_5 = arith.constant 1 : index
    %c0_6 = arith.constant 0 : index
    %c0_7 = arith.constant 0 : index
    %8 = vector.load %arg1[%c1_5, %c0_6, %c0_7] : memref<16x32x64xf32, #tpu.memory_space<vmem>>, vector<1x32x64xf32>
    %9 = vector.shape_cast %8 : vector<1x32x64xf32> to vector<32x64xf32>
    %10 = vector.broadcast %7 : f32 to vector<32x64xf32>
    %11 = arith.mulf %10, %9 : vector<32x64xf32>
    %12 = arith.addf %6, %11 : vector<32x64xf32>
    %c2 = arith.constant 2 : index
    %13 = memref.load %arg0[%c2] : memref<16xf32, #tpu.memory_space<smem>>
    %c2_8 = arith.constant 2 : index
    %c0_9 = arith.constant 0 : index
    %c0_10 = arith.constant 0 : index
    %14 = vector.load %arg1[%c2_8, %c0_9, %c0_10] : memref<16x32x64xf32, #tpu.memory_space<vmem>>, vector<1x32x64xf32>
    %15 = vector.shape_cast %14 : vector<1x32x64xf32> to vector<32x64xf32>
    %16 = vector.broadcast %13 : f32 to vector<32x64xf32>
    %17 = arith.mulf %16, %15 : vector<32x64xf32>
    %18 = arith.addf %12, %17 : vector<32x64xf32>
    %c3 = arith.constant 3 : index
    %19 = memref.load %arg0[%c3] : memref<16xf32, #tpu.memory_space<smem>>
    %c3_11 = arith.constant 3 : index
    %c0_12 = arith.constant 0 : index
    %c0_13 = arith.constant 0 : index
    %20 = vector.load %arg1[%c3_11, %c0_12, %c0_13] : memref<16x32x64xf32, #tpu.memory_space<vmem>>, vector<1x32x64xf32>
    %21 = vector.shape_cast %20 : vector<1x32x64xf32> to vector<32x64xf32>
    %22 = vector.broadcast %19 : f32 to vector<32x64xf32>
    %23 = arith.mulf %22, %21 : vector<32x64xf32>
    %24 = arith.addf %18, %23 : vector<32x64xf32>
    %c4 = arith.constant 4 : index
    %25 = memref.load %arg0[%c4] : memref<16xf32, #tpu.memory_space<smem>>
    %c4_14 = arith.constant 4 : index
    %c0_15 = arith.constant 0 : index
    %c0_16 = arith.constant 0 : index
    %26 = vector.load %arg1[%c4_14, %c0_15, %c0_16] : memref<16x32x64xf32, #tpu.memory_space<vmem>>, vector<1x32x64xf32>
    %27 = vector.shape_cast %26 : vector<1x32x64xf32> to vector<32x64xf32>
    %28 = vector.broadcast %25 : f32 to vector<32x64xf32>
    %29 = arith.mulf %28, %27 : vector<32x64xf32>
    %30 = arith.addf %24, %29 : vector<32x64xf32>
    %c5 = arith.constant 5 : index
    %31 = memref.load %arg0[%c5] : memref<16xf32, #tpu.memory_space<smem>>
    %c5_17 = arith.constant 5 : index
    %c0_18 = arith.constant 0 : index
    %c0_19 = arith.constant 0 : index
    %32 = vector.load %arg1[%c5_17, %c0_18, %c0_19] : memref<16x32x64xf32, #tpu.memory_space<vmem>>, vector<1x32x64xf32>
    %33 = vector.shape_cast %32 : vector<1x32x64xf32> to vector<32x64xf32>
    %34 = vector.broadcast %31 : f32 to vector<32x64xf32>
    %35 = arith.mulf %34, %33 : vector<32x64xf32>
    %36 = arith.addf %30, %35 : vector<32x64xf32>
    %c6 = arith.constant 6 : index
    %37 = memref.load %arg0[%c6] : memref<16xf32, #tpu.memory_space<smem>>
    %c6_20 = arith.constant 6 : index
    %c0_21 = arith.constant 0 : index
    %c0_22 = arith.constant 0 : index
    %38 = vector.load %arg1[%c6_20, %c0_21, %c0_22] : memref<16x32x64xf32, #tpu.memory_space<vmem>>, vector<1x32x64xf32>
    %39 = vector.shape_cast %38 : vector<1x32x64xf32> to vector<32x64xf32>
    %40 = vector.broadcast %37 : f32 to vector<32x64xf32>
    %41 = arith.mulf %40, %39 : vector<32x64xf32>
    %42 = arith.addf %36, %41 : vector<32x64xf32>
    %c7 = arith.constant 7 : index
    %43 = memref.load %arg0[%c7] : memref<16xf32, #tpu.memory_space<smem>>
    %c7_23 = arith.constant 7 : index
    %c0_24 = arith.constant 0 : index
    %c0_25 = arith.constant 0 : index
    %44 = vector.load %arg1[%c7_23, %c0_24, %c0_25] : memref<16x32x64xf32, #tpu.memory_space<vmem>>, vector<1x32x64xf32>
    %45 = vector.shape_cast %44 : vector<1x32x64xf32> to vector<32x64xf32>
    %46 = vector.broadcast %43 : f32 to vector<32x64xf32>
    %47 = arith.mulf %46, %45 : vector<32x64xf32>
    %48 = arith.addf %42, %47 : vector<32x64xf32>
    %c8 = arith.constant 8 : index
    %49 = memref.load %arg0[%c8] : memref<16xf32, #tpu.memory_space<smem>>
    %c8_26 = arith.constant 8 : index
    %c0_27 = arith.constant 0 : index
    %c0_28 = arith.constant 0 : index
    %50 = vector.load %arg1[%c8_26, %c0_27, %c0_28] : memref<16x32x64xf32, #tpu.memory_space<vmem>>, vector<1x32x64xf32>
    %51 = vector.shape_cast %50 : vector<1x32x64xf32> to vector<32x64xf32>
    %52 = vector.broadcast %49 : f32 to vector<32x64xf32>
    %53 = arith.mulf %52, %51 : vector<32x64xf32>
    %54 = arith.addf %48, %53 : vector<32x64xf32>
    %c9 = arith.constant 9 : index
    %55 = memref.load %arg0[%c9] : memref<16xf32, #tpu.memory_space<smem>>
    %c9_29 = arith.constant 9 : index
    %c0_30 = arith.constant 0 : index
    %c0_31 = arith.constant 0 : index
    %56 = vector.load %arg1[%c9_29, %c0_30, %c0_31] : memref<16x32x64xf32, #tpu.memory_space<vmem>>, vector<1x32x64xf32>
    %57 = vector.shape_cast %56 : vector<1x32x64xf32> to vector<32x64xf32>
    %58 = vector.broadcast %55 : f32 to vector<32x64xf32>
    %59 = arith.mulf %58, %57 : vector<32x64xf32>
    %60 = arith.addf %54, %59 : vector<32x64xf32>
    %c10 = arith.constant 10 : index
    %61 = memref.load %arg0[%c10] : memref<16xf32, #tpu.memory_space<smem>>
    %c10_32 = arith.constant 10 : index
    %c0_33 = arith.constant 0 : index
    %c0_34 = arith.constant 0 : index
    %62 = vector.load %arg1[%c10_32, %c0_33, %c0_34] : memref<16x32x64xf32, #tpu.memory_space<vmem>>, vector<1x32x64xf32>
    %63 = vector.shape_cast %62 : vector<1x32x64xf32> to vector<32x64xf32>
    %64 = vector.broadcast %61 : f32 to vector<32x64xf32>
    %65 = arith.mulf %64, %63 : vector<32x64xf32>
    %66 = arith.addf %60, %65 : vector<32x64xf32>
    %c11 = arith.constant 11 : index
    %67 = memref.load %arg0[%c11] : memref<16xf32, #tpu.memory_space<smem>>
    %c11_35 = arith.constant 11 : index
    %c0_36 = arith.constant 0 : index
    %c0_37 = arith.constant 0 : index
    %68 = vector.load %arg1[%c11_35, %c0_36, %c0_37] : memref<16x32x64xf32, #tpu.memory_space<vmem>>, vector<1x32x64xf32>
    %69 = vector.shape_cast %68 : vector<1x32x64xf32> to vector<32x64xf32>
    %70 = vector.broadcast %67 : f32 to vector<32x64xf32>
    %71 = arith.mulf %70, %69 : vector<32x64xf32>
    %72 = arith.addf %66, %71 : vector<32x64xf32>
    %c12 = arith.constant 12 : index
    %73 = memref.load %arg0[%c12] : memref<16xf32, #tpu.memory_space<smem>>
    %c12_38 = arith.constant 12 : index
    %c0_39 = arith.constant 0 : index
    %c0_40 = arith.constant 0 : index
    %74 = vector.load %arg1[%c12_38, %c0_39, %c0_40] : memref<16x32x64xf32, #tpu.memory_space<vmem>>, vector<1x32x64xf32>
    %75 = vector.shape_cast %74 : vector<1x32x64xf32> to vector<32x64xf32>
    %76 = vector.broadcast %73 : f32 to vector<32x64xf32>
    %77 = arith.mulf %76, %75 : vector<32x64xf32>
    %78 = arith.addf %72, %77 : vector<32x64xf32>
    %c13 = arith.constant 13 : index
    %79 = memref.load %arg0[%c13] : memref<16xf32, #tpu.memory_space<smem>>
    %c13_41 = arith.constant 13 : index
    %c0_42 = arith.constant 0 : index
    %c0_43 = arith.constant 0 : index
    %80 = vector.load %arg1[%c13_41, %c0_42, %c0_43] : memref<16x32x64xf32, #tpu.memory_space<vmem>>, vector<1x32x64xf32>
    %81 = vector.shape_cast %80 : vector<1x32x64xf32> to vector<32x64xf32>
    %82 = vector.broadcast %79 : f32 to vector<32x64xf32>
    %83 = arith.mulf %82, %81 : vector<32x64xf32>
    %84 = arith.addf %78, %83 : vector<32x64xf32>
    %c14 = arith.constant 14 : index
    %85 = memref.load %arg0[%c14] : memref<16xf32, #tpu.memory_space<smem>>
    %c14_44 = arith.constant 14 : index
    %c0_45 = arith.constant 0 : index
    %c0_46 = arith.constant 0 : index
    %86 = vector.load %arg1[%c14_44, %c0_45, %c0_46] : memref<16x32x64xf32, #tpu.memory_space<vmem>>, vector<1x32x64xf32>
    %87 = vector.shape_cast %86 : vector<1x32x64xf32> to vector<32x64xf32>
    %88 = vector.broadcast %85 : f32 to vector<32x64xf32>
    %89 = arith.mulf %88, %87 : vector<32x64xf32>
    %90 = arith.addf %84, %89 : vector<32x64xf32>
    %c15 = arith.constant 15 : index
    %91 = memref.load %arg0[%c15] : memref<16xf32, #tpu.memory_space<smem>>
    %c15_47 = arith.constant 15 : index
    %c0_48 = arith.constant 0 : index
    %c0_49 = arith.constant 0 : index
    %92 = vector.load %arg1[%c15_47, %c0_48, %c0_49] : memref<16x32x64xf32, #tpu.memory_space<vmem>>, vector<1x32x64xf32>
    %93 = vector.shape_cast %92 : vector<1x32x64xf32> to vector<32x64xf32>
    %94 = vector.broadcast %91 : f32 to vector<32x64xf32>
    %95 = arith.mulf %94, %93 : vector<32x64xf32>
    %96 = arith.addf %90, %95 : vector<32x64xf32>
    %c0_50 = arith.constant 0 : index
    %c0_51 = arith.constant 0 : index
    %97 = vector.load %arg3[%c0_50, %c0_51] : memref<64x64xf32, #tpu.memory_space<vmem>>, vector<64x64xf32>
    %cst = arith.constant dense<0.000000e+00> : vector<32x64xf32>
    %98 = tpu.matmul %96, %97, %cst {dimension_numbers = #tpu.dot_dimension_numbers<[1], [0], [0], [1], [0, 0, 1, 1], [], []>} : vector<32x64xf32>, vector<64x64xf32>, vector<32x64xf32> -> vector<32x64xf32>
    %cst_52 = arith.constant dense<0.000000e+00> : vector<32x64xf32>
    %99 = tpu.matmul %98, %97, %cst_52 {dimension_numbers = #tpu.dot_dimension_numbers<[1], [0], [0], [1], [0, 0, 1, 1], [], []>} : vector<32x64xf32>, vector<64x64xf32>, vector<32x64xf32> -> vector<32x64xf32>
    %cst_53 = arith.constant 2.000000e+00 : f32
    %100 = vector.broadcast %cst_53 : f32 to vector<32x64xf32>
    %101 = arith.mulf %100, %99 : vector<32x64xf32>
    %102 = arith.subf %101, %96 : vector<32x64xf32>
    %cst_54 = arith.constant dense<0.000000e+00> : vector<32x64xf32>
    %103 = tpu.matmul %102, %97, %cst_54 {dimension_numbers = #tpu.dot_dimension_numbers<[1], [0], [0], [1], [0, 0, 1, 1], [], []>} : vector<32x64xf32>, vector<64x64xf32>, vector<32x64xf32> -> vector<32x64xf32>
    %cst_55 = arith.constant 2.000000e+00 : f32
    %104 = vector.broadcast %cst_55 : f32 to vector<32x64xf32>
    %105 = arith.mulf %104, %103 : vector<32x64xf32>
    %106 = arith.subf %105, %98 : vector<32x64xf32>
    %cst_56 = arith.constant dense<0.000000e+00> : vector<32x64xf32>
    %107 = tpu.matmul %106, %97, %cst_56 {dimension_numbers = #tpu.dot_dimension_numbers<[1], [0], [0], [1], [0, 0, 1, 1], [], []>} : vector<32x64xf32>, vector<64x64xf32>, vector<32x64xf32> -> vector<32x64xf32>
    %cst_57 = arith.constant 2.000000e+00 : f32
    %108 = vector.broadcast %cst_57 : f32 to vector<32x64xf32>
    %109 = arith.mulf %108, %107 : vector<32x64xf32>
    %110 = arith.subf %109, %102 : vector<32x64xf32>
    %cst_58 = arith.constant dense<0.000000e+00> : vector<32x64xf32>
    %111 = tpu.matmul %110, %97, %cst_58 {dimension_numbers = #tpu.dot_dimension_numbers<[1], [0], [0], [1], [0, 0, 1, 1], [], []>} : vector<32x64xf32>, vector<64x64xf32>, vector<32x64xf32> -> vector<32x64xf32>
    %cst_59 = arith.constant 2.000000e+00 : f32
    %112 = vector.broadcast %cst_59 : f32 to vector<32x64xf32>
    %113 = arith.mulf %112, %111 : vector<32x64xf32>
    %114 = arith.subf %113, %106 : vector<32x64xf32>
    %115 = tpu.concatenate %96, %98, %102, %106, %110, %114 in 0 : vector<32x64xf32>, vector<32x64xf32>, vector<32x64xf32>, vector<32x64xf32>, vector<32x64xf32>, vector<32x64xf32> -> vector<192x64xf32>
    %c0_60 = arith.constant 0 : index
    %c0_61 = arith.constant 0 : index
    %116 = vector.load %arg4[%c0_60, %c0_61] : memref<32x192xf32, #tpu.memory_space<vmem>>, vector<32x192xf32>
    %cst_62 = arith.constant dense<0.000000e+00> : vector<32x64xf32>
    %117 = tpu.matmul %116, %115, %cst_62 {dimension_numbers = #tpu.dot_dimension_numbers<[1], [0], [0], [1], [0, 0, 1, 1], [], []>} : vector<32x192xf32>, vector<192x64xf32>, vector<32x64xf32> -> vector<32x64xf32>
    %c0_63 = arith.constant 0 : index
    %c0_64 = arith.constant 0 : index
    %118 = vector.load %arg5[%c0_63, %c0_64] : memref<32x1xf32, #tpu.memory_space<vmem>>, vector<32x1xf32>
    %119 = vector.broadcast %118 : vector<32x1xf32> to vector<32x64xf32>
    %120 = arith.addf %117, %119 : vector<32x64xf32>
    %cst_65 = arith.constant 0.000000e+00 : f32
    %121 = vector.broadcast %cst_65 : f32 to vector<32x64xf32>
    %122 = arith.maximumf %120, %121 : vector<32x64xf32>
    %c0_66 = arith.constant 0 : index
    %c0_67 = arith.constant 0 : index
    %123 = vector.load %arg6[%c0_66, %c0_67] : memref<64x96xf32, #tpu.memory_space<vmem>>, vector<64x96xf32>
    %cst_68 = arith.constant dense<0.000000e+00> : vector<32x96xf32>
    %124 = tpu.matmul %122, %123, %cst_68 {dimension_numbers = #tpu.dot_dimension_numbers<[1], [0], [0], [1], [0, 0, 1, 1], [], []>} : vector<32x64xf32>, vector<64x96xf32>, vector<32x96xf32> -> vector<32x96xf32>
    %c0_69 = arith.constant 0 : index
    %c0_70 = arith.constant 0 : index
    %125 = vector.load %arg7[%c0_69, %c0_70] : memref<96x96xf32, #tpu.memory_space<vmem>>, vector<96x96xf32>
    %cst_71 = arith.constant dense<0.000000e+00> : vector<32x96xf32>
    %126 = tpu.matmul %124, %125, %cst_71 {dimension_numbers = #tpu.dot_dimension_numbers<[1], [0], [0], [1], [0, 0, 1, 1], [], []>} : vector<32x96xf32>, vector<96x96xf32>, vector<32x96xf32> -> vector<32x96xf32>
    %cst_72 = arith.constant dense<0.000000e+00> : vector<32x96xf32>
    %127 = tpu.matmul %126, %125, %cst_72 {dimension_numbers = #tpu.dot_dimension_numbers<[1], [0], [0], [1], [0, 0, 1, 1], [], []>} : vector<32x96xf32>, vector<96x96xf32>, vector<32x96xf32> -> vector<32x96xf32>
    %cst_73 = arith.constant 2.000000e+00 : f32
    %128 = vector.broadcast %cst_73 : f32 to vector<32x96xf32>
    %129 = arith.mulf %128, %127 : vector<32x96xf32>
    %130 = arith.subf %129, %124 : vector<32x96xf32>
    %cst_74 = arith.constant dense<0.000000e+00> : vector<32x96xf32>
    %131 = tpu.matmul %130, %125, %cst_74 {dimension_numbers = #tpu.dot_dimension_numbers<[1], [0], [0], [1], [0, 0, 1, 1], [], []>} : vector<32x96xf32>, vector<96x96xf32>, vector<32x96xf32> -> vector<32x96xf32>
    %cst_75 = arith.constant 2.000000e+00 : f32
    %132 = vector.broadcast %cst_75 : f32 to vector<32x96xf32>
    %133 = arith.mulf %132, %131 : vector<32x96xf32>
    %134 = arith.subf %133, %126 : vector<32x96xf32>
    %cst_76 = arith.constant dense<0.000000e+00> : vector<32x96xf32>
    %135 = tpu.matmul %134, %125, %cst_76 {dimension_numbers = #tpu.dot_dimension_numbers<[1], [0], [0], [1], [0, 0, 1, 1], [], []>} : vector<32x96xf32>, vector<96x96xf32>, vector<32x96xf32> -> vector<32x96xf32>
    %cst_77 = arith.constant 2.000000e+00 : f32
    %136 = vector.broadcast %cst_77 : f32 to vector<32x96xf32>
    %137 = arith.mulf %136, %135 : vector<32x96xf32>
    %138 = arith.subf %137, %130 : vector<32x96xf32>
    %cst_78 = arith.constant dense<0.000000e+00> : vector<32x96xf32>
    %139 = tpu.matmul %138, %125, %cst_78 {dimension_numbers = #tpu.dot_dimension_numbers<[1], [0], [0], [1], [0, 0, 1, 1], [], []>} : vector<32x96xf32>, vector<96x96xf32>, vector<32x96xf32> -> vector<32x96xf32>
    %cst_79 = arith.constant 2.000000e+00 : f32
    %140 = vector.broadcast %cst_79 : f32 to vector<32x96xf32>
    %141 = arith.mulf %140, %139 : vector<32x96xf32>
    %142 = arith.subf %141, %134 : vector<32x96xf32>
    %143 = tpu.concatenate %124, %126, %130, %134, %138, %142 in 0 : vector<32x96xf32>, vector<32x96xf32>, vector<32x96xf32>, vector<32x96xf32>, vector<32x96xf32>, vector<32x96xf32> -> vector<192x96xf32>
    %c0_80 = arith.constant 0 : index
    %c0_81 = arith.constant 0 : index
    %144 = vector.load %arg8[%c0_80, %c0_81] : memref<16x192xf32, #tpu.memory_space<vmem>>, vector<16x192xf32>
    %cst_82 = arith.constant dense<0.000000e+00> : vector<16x96xf32>
    %145 = tpu.matmul %144, %143, %cst_82 {dimension_numbers = #tpu.dot_dimension_numbers<[1], [0], [0], [1], [0, 0, 1, 1], [], []>} : vector<16x192xf32>, vector<192x96xf32>, vector<16x96xf32> -> vector<16x96xf32>
    %c0_83 = arith.constant 0 : index
    %c0_84 = arith.constant 0 : index
    %146 = vector.load %arg9[%c0_83, %c0_84] : memref<16x1xf32, #tpu.memory_space<vmem>>, vector<16x1xf32>
    %147 = vector.broadcast %146 : vector<16x1xf32> to vector<16x96xf32>
    %148 = arith.addf %145, %147 : vector<16x96xf32>
    %cst_85 = arith.constant 0.000000e+00 : f32
    %149 = vector.broadcast %cst_85 : f32 to vector<16x96xf32>
    %150 = arith.maximumf %148, %149 : vector<16x96xf32>
    %c0_86 = arith.constant 0 : index
    %c0_87 = arith.constant 0 : index
    %151 = vector.load %arg10[%c0_86, %c0_87] : memref<96x128xf32, #tpu.memory_space<vmem>>, vector<96x128xf32>
    %cst_88 = arith.constant dense<0.000000e+00> : vector<16x128xf32>
    %152 = tpu.matmul %150, %151, %cst_88 {dimension_numbers = #tpu.dot_dimension_numbers<[1], [0], [0], [1], [0, 0, 1, 1], [], []>} : vector<16x96xf32>, vector<96x128xf32>, vector<16x128xf32> -> vector<16x128xf32>
    %c0_89 = arith.constant 0 : index
    %c0_90 = arith.constant 0 : index
    %153 = vector.load %arg11[%c0_89, %c0_90] : memref<128x128xf32, #tpu.memory_space<vmem>>, vector<128x128xf32>
    %cst_91 = arith.constant dense<0.000000e+00> : vector<16x128xf32>
    %154 = tpu.matmul %152, %153, %cst_91 {dimension_numbers = #tpu.dot_dimension_numbers<[1], [0], [0], [1], [0, 0, 1, 1], [], []>} : vector<16x128xf32>, vector<128x128xf32>, vector<16x128xf32> -> vector<16x128xf32>
    %cst_92 = arith.constant dense<0.000000e+00> : vector<16x128xf32>
    %155 = tpu.matmul %154, %153, %cst_92 {dimension_numbers = #tpu.dot_dimension_numbers<[1], [0], [0], [1], [0, 0, 1, 1], [], []>} : vector<16x128xf32>, vector<128x128xf32>, vector<16x128xf32> -> vector<16x128xf32>
    %cst_93 = arith.constant 2.000000e+00 : f32
    %156 = vector.broadcast %cst_93 : f32 to vector<16x128xf32>
    %157 = arith.mulf %156, %155 : vector<16x128xf32>
    %158 = arith.subf %157, %152 : vector<16x128xf32>
    %cst_94 = arith.constant dense<0.000000e+00> : vector<16x128xf32>
    %159 = tpu.matmul %158, %153, %cst_94 {dimension_numbers = #tpu.dot_dimension_numbers<[1], [0], [0], [1], [0, 0, 1, 1], [], []>} : vector<16x128xf32>, vector<128x128xf32>, vector<16x128xf32> -> vector<16x128xf32>
    %cst_95 = arith.constant 2.000000e+00 : f32
    %160 = vector.broadcast %cst_95 : f32 to vector<16x128xf32>
    %161 = arith.mulf %160, %159 : vector<16x128xf32>
    %162 = arith.subf %161, %154 : vector<16x128xf32>
    %cst_96 = arith.constant dense<0.000000e+00> : vector<16x128xf32>
    %163 = tpu.matmul %162, %153, %cst_96 {dimension_numbers = #tpu.dot_dimension_numbers<[1], [0], [0], [1], [0, 0, 1, 1], [], []>} : vector<16x128xf32>, vector<128x128xf32>, vector<16x128xf32> -> vector<16x128xf32>
    %cst_97 = arith.constant 2.000000e+00 : f32
    %164 = vector.broadcast %cst_97 : f32 to vector<16x128xf32>
    %165 = arith.mulf %164, %163 : vector<16x128xf32>
    %166 = arith.subf %165, %158 : vector<16x128xf32>
    %cst_98 = arith.constant dense<0.000000e+00> : vector<16x128xf32>
    %167 = tpu.matmul %166, %153, %cst_98 {dimension_numbers = #tpu.dot_dimension_numbers<[1], [0], [0], [1], [0, 0, 1, 1], [], []>} : vector<16x128xf32>, vector<128x128xf32>, vector<16x128xf32> -> vector<16x128xf32>
    %cst_99 = arith.constant 2.000000e+00 : f32
    %168 = vector.broadcast %cst_99 : f32 to vector<16x128xf32>
    %169 = arith.mulf %168, %167 : vector<16x128xf32>
    %170 = arith.subf %169, %162 : vector<16x128xf32>
    %171 = tpu.concatenate %152, %154, %158, %162, %166, %170 in 0 : vector<16x128xf32>, vector<16x128xf32>, vector<16x128xf32>, vector<16x128xf32>, vector<16x128xf32>, vector<16x128xf32> -> vector<96x128xf32>
    %c0_100 = arith.constant 0 : index
    %c0_101 = arith.constant 0 : index
    %172 = vector.load %arg12[%c0_100, %c0_101] : memref<16x96xf32, #tpu.memory_space<vmem>>, vector<16x96xf32>
    %cst_102 = arith.constant dense<0.000000e+00> : vector<16x128xf32>
    %173 = tpu.matmul %172, %171, %cst_102 {dimension_numbers = #tpu.dot_dimension_numbers<[1], [0], [0], [1], [0, 0, 1, 1], [], []>} : vector<16x96xf32>, vector<96x128xf32>, vector<16x128xf32> -> vector<16x128xf32>
    %c0_103 = arith.constant 0 : index
    %c0_104 = arith.constant 0 : index
    %174 = vector.load %arg13[%c0_103, %c0_104] : memref<16x1xf32, #tpu.memory_space<vmem>>, vector<16x1xf32>
    %175 = vector.broadcast %174 : vector<16x1xf32> to vector<16x128xf32>
    %176 = arith.addf %173, %175 : vector<16x128xf32>
    %cst_105 = arith.constant 0.000000e+00 : f32
    %177 = vector.broadcast %cst_105 : f32 to vector<16x128xf32>
    %178 = arith.maximumf %176, %177 : vector<16x128xf32>
    %c0_106 = arith.constant 0 : index
    %c0_107 = arith.constant 0 : index
    %179 = vector.load %arg14[%c0_106, %c0_107] : memref<128x160xf32, #tpu.memory_space<vmem>>, vector<128x160xf32>
    %cst_108 = arith.constant dense<0.000000e+00> : vector<16x160xf32>
    %180 = tpu.matmul %178, %179, %cst_108 {dimension_numbers = #tpu.dot_dimension_numbers<[1], [0], [0], [1], [0, 0, 1, 1], [], []>} : vector<16x128xf32>, vector<128x160xf32>, vector<16x160xf32> -> vector<16x160xf32>
    %c0_109 = arith.constant 0 : index
    %c0_110 = arith.constant 0 : index
    %181 = vector.load %arg15[%c0_109, %c0_110] : memref<160x160xf32, #tpu.memory_space<vmem>>, vector<160x160xf32>
    %cst_111 = arith.constant dense<0.000000e+00> : vector<16x160xf32>
    %182 = tpu.matmul %180, %181, %cst_111 {dimension_numbers = #tpu.dot_dimension_numbers<[1], [0], [0], [1], [0, 0, 1, 1], [], []>} : vector<16x160xf32>, vector<160x160xf32>, vector<16x160xf32> -> vector<16x160xf32>
    %cst_112 = arith.constant dense<0.000000e+00> : vector<16x160xf32>
    %183 = tpu.matmul %182, %181, %cst_112 {dimension_numbers = #tpu.dot_dimension_numbers<[1], [0], [0], [1], [0, 0, 1, 1], [], []>} : vector<16x160xf32>, vector<160x160xf32>, vector<16x160xf32> -> vector<16x160xf32>
    %cst_113 = arith.constant 2.000000e+00 : f32
    %184 = vector.broadcast %cst_113 : f32 to vector<16x160xf32>
    %185 = arith.mulf %184, %183 : vector<16x160xf32>
    %186 = arith.subf %185, %180 : vector<16x160xf32>
    %cst_114 = arith.constant dense<0.000000e+00> : vector<16x160xf32>
    %187 = tpu.matmul %186, %181, %cst_114 {dimension_numbers = #tpu.dot_dimension_numbers<[1], [0], [0], [1], [0, 0, 1, 1], [], []>} : vector<16x160xf32>, vector<160x160xf32>, vector<16x160xf32> -> vector<16x160xf32>
    %cst_115 = arith.constant 2.000000e+00 : f32
    %188 = vector.broadcast %cst_115 : f32 to vector<16x160xf32>
    %189 = arith.mulf %188, %187 : vector<16x160xf32>
    %190 = arith.subf %189, %182 : vector<16x160xf32>
    %cst_116 = arith.constant dense<0.000000e+00> : vector<16x160xf32>
    %191 = tpu.matmul %190, %181, %cst_116 {dimension_numbers = #tpu.dot_dimension_numbers<[1], [0], [0], [1], [0, 0, 1, 1], [], []>} : vector<16x160xf32>, vector<160x160xf32>, vector<16x160xf32> -> vector<16x160xf32>
    %cst_117 = arith.constant 2.000000e+00 : f32
    %192 = vector.broadcast %cst_117 : f32 to vector<16x160xf32>
    %193 = arith.mulf %192, %191 : vector<16x160xf32>
    %194 = arith.subf %193, %186 : vector<16x160xf32>
    %cst_118 = arith.constant dense<0.000000e+00> : vector<16x160xf32>
    %195 = tpu.matmul %194, %181, %cst_118 {dimension_numbers = #tpu.dot_dimension_numbers<[1], [0], [0], [1], [0, 0, 1, 1], [], []>} : vector<16x160xf32>, vector<160x160xf32>, vector<16x160xf32> -> vector<16x160xf32>
    %cst_119 = arith.constant 2.000000e+00 : f32
    %196 = vector.broadcast %cst_119 : f32 to vector<16x160xf32>
    %197 = arith.mulf %196, %195 : vector<16x160xf32>
    %198 = arith.subf %197, %190 : vector<16x160xf32>
    %199 = tpu.concatenate %180, %182, %186, %190, %194, %198 in 0 : vector<16x160xf32>, vector<16x160xf32>, vector<16x160xf32>, vector<16x160xf32>, vector<16x160xf32>, vector<16x160xf32> -> vector<96x160xf32>
    %c0_120 = arith.constant 0 : index
    %c0_121 = arith.constant 0 : index
    %200 = vector.load %arg16[%c0_120, %c0_121] : memref<3x96xf32, #tpu.memory_space<vmem>>, vector<3x96xf32>
    %cst_122 = arith.constant dense<0.000000e+00> : vector<3x160xf32>
    %201 = tpu.matmul %200, %199, %cst_122 {dimension_numbers = #tpu.dot_dimension_numbers<[1], [0], [0], [1], [0, 0, 1, 1], [], []>} : vector<3x96xf32>, vector<96x160xf32>, vector<3x160xf32> -> vector<3x160xf32>
    %c0_123 = arith.constant 0 : index
    %c0_124 = arith.constant 0 : index
    %202 = vector.load %arg17[%c0_123, %c0_124] : memref<3x1xf32, #tpu.memory_space<vmem>>, vector<3x1xf32>
    %203 = vector.broadcast %202 : vector<3x1xf32> to vector<3x160xf32>
    %204 = arith.addf %201, %203 : vector<3x160xf32>
    %c0_125 = arith.constant 0 : index
    %c0_126 = arith.constant 0 : index
    %205 = vector.load %arg18[%c0_125, %c0_126] : memref<3x160xf32, #tpu.memory_space<vmem>>, vector<3x160xf32>
    tpu.vector_store %arg18[%c0_125, %c0_126], %204 {strides = array<i32>} : memref<3x160xf32, #tpu.memory_space<vmem>>, vector<3x160xf32>,
    return
  }
}

</mosaic_0001>

<bundles_post_ra>
// kernel: decoder_forward.1
= control target key start
LH: loop header
LB: loop body
LE: loop exit
PB: predicated region body
PF: predicated region fallthrough
CT: control target
= control target key end

     0   :  { %s3689_s0 = inlined_call_operand.vmem [shape: f32[16], index: 0, kind: input, shape index: {}]   ;;  %s3690_s1 = inlined_call_operand.hbm [shape: f32[16,32,64], index: 1, kind: input, shape index: {}]   ;;  %s3691_s2 = inlined_call_operand.vmem [shape: f32[32,64], index: 2, kind: input, shape index: {}]   ;;  %s3692_s3 = inlined_call_operand.hbm [shape: f32[64,64], index: 3, kind: input, shape index: {}]   ;;  %s3693_s4 = inlined_call_operand.hbm [shape: f32[32,192], index: 4, kind: input, shape index: {}]   ;;  %s3694_s5 = inlined_call_operand.vmem [shape: f32[32,1], index: 5, kind: input, shape index: {}]   ;;  %s3695_s6 = inlined_call_operand.hbm [shape: f32[64,96], index: 6, kind: input, shape index: {}]   ;;  %s3696_s7 = inlined_call_operand.hbm [shape: f32[96,96], index: 7, kind: input, shape index: {}]   ;;  %s3697_s8 = inlined_call_operand.hbm [shape: f32[16,192], index: 8, kind: input, shape index: {}]   ;;  %s3698_s9 = inlined_call_operand.vmem [shape: f32[16,1], index: 9, kind: input, shape index: {}]   ;;  %s3699_s10 = inlined_call_operand.hbm [shape: f32[96,128], index: 10, kind: input, shape index: {}]   ;;  %s3700_s11 = inlined_call_operand.vmem [shape: f32[128,128], index: 11, kind: input, shape index: {}]   ;;  %s3701_s12 = inlined_call_operand.vmem [shape: f32[16,96], index: 12, kind: input, shape index: {}]   ;;  %s3702_s13 = inlined_call_operand.vmem [shape: f32[16,1], index: 13, kind: input, shape index: {}]   ;;  %s3703_s14 = inlined_call_operand.vmem [shape: f32[128,160], index: 14, kind: input, shape index: {}]   ;;  %s3704_s15 = inlined_call_operand.vmem [shape: f32[160,160], index: 15, kind: input, shape index: {}]   ;;  %s3705_s16 = inlined_call_operand.vmem [shape: f32[3,96], index: 16, kind: input, shape index: {}]   ;;  %s3706_s17 = inlined_call_operand.vmem [shape: f32[3,1], index: 17, kind: input, shape index: {}]   ;;  %s3707_s18 = inlined_call_operand.hbm [shape: f32[3,160], index: 18, kind: output, shape index: {}]  }
   0x1   :  { %3713 = sst [smem:[#allocation23_spill]] %s3689_s0 }
   0x2   :  { %3714 = sst [smem:[#allocation24_spill]] %s3690_s1 }
   0x3   :  { %3715 = sst [smem:[#allocation25_spill]] %s3691_s2 }
   0x4   :  { %23 = vsyncpa [#allocation5], 0 }
   0x5   :  { %24 = vsyncpa [#allocation3], 0 }
   0x6   :  { %25 = vsyncpa [#allocation8], 0 }
   0x7   :  { %26 = vsyncpa [#allocation11], 0 }
   0x8   :  { %27 = vsyncpa [#allocation14], 0 }
   0x9   :  { %28 = vsyncpa [#allocation4], 0  ;;  %s57_s29 = sshll.u32 %s3692_s3, 4  ;;  %s2425_s30 = smov [#allocation7]   ;;  %s58_s29 = int_to_ptr.hbm [resolvable:$true] %s57_s29 }
   0xa   :  { %s59_s0 = sshll.u32 %s2425_s30, 4  ;;  %s85_s20 = sshll.u32 %s3695_s6, 4  ;;  %s60_s0 = int_to_ptr.vmem [resolvable:$true] %s59_s0  ;;  %s86_s20 = int_to_ptr.hbm [resolvable:$true] %s85_s20 }
   0xb   :  { %s3709_s21 = smov 128   ;;  %s3711_s22 = smov 8  }
   0xc   :  { %65 = dma.hbm_to_vmem [thread:$0]  %s58_s29, 1024, %s60_s0, [#allocation8], %s3709_s21, %s3709_s21, %s3711_s22  }
   0xd   :  { %s2428_s2 = smov [#allocation10]   ;;  %s111_s25 = sshll.u32 %s3697_s8, 4  ;;  %s112_s25 = int_to_ptr.hbm [resolvable:$true] %s111_s25 }
   0xe   :  { %s87_s23 = sshll.u32 %s2428_s2, 4  ;;  %s2429_s6 = smov [#allocation13]   ;;  %s88_s23 = int_to_ptr.vmem [resolvable:$true] %s87_s23 }
   0xf   :  { %93 = dma.hbm_to_vmem [thread:$0]  %s86_s20, 1024, %s88_s23, [#allocation11], %s3709_s21, %s3709_s21, %s3711_s22  }
  0x10   :  { %s113_s26 = sshll.u32 %s2429_s6, 4  ;;  %s3716_s30 = sld [smem:[#allocation23_spill]]  ;;  %s114_s26 = int_to_ptr.vmem [resolvable:$true] %s113_s26 }
  0x11   :  { %s2430_s0 = smov 256   ;;  %s2431_s19 = smov 16  }
  0x12   :  { %119 = dma.hbm_to_vmem [thread:$0]  %s112_s25, 512, %s114_s26, [#allocation14], %s2430_s0, %s2430_s0, %s2431_s19  }
  0x13   :  { %s2432_s1 = smov [#allocation2]   ;;  %s3717_s23 = sld [smem:[#allocation24_spill]] }
  0x14   :  { %s2433_s8 = smov [#allocation6]   ;;  %s70_s22 = sshll.u32 %s3693_s4, 4  ;;  %s71_s22 = int_to_ptr.hbm [resolvable:$true] %s70_s22 }
  0x15   :  { %s44_s3 = sshll.u32 %s2433_s8, 4  ;;  %s3718_s27 = smov 8   ;;  %s45_s3 = int_to_ptr.vmem [resolvable:$true] %s44_s3 }
  0x16   :  { %s34_s29 = sshll.u32 %s3716_s30, 4  ;;  %s3719_s28 = smov 128   ;;  %s35_s29 = int_to_ptr.vmem [resolvable:$true] %s34_s29 }
  0x17   :  { %37 = dma.vmem_to_smem %s35_s29, 16, %s2432_s1, [#allocation5]  }
  0x18   :  { %s2434_s25 = smov [#allocation9]   ;;  %s98_s1 = sshll.u32 %s3696_s7, 4  ;;  %s99_s1 = int_to_ptr.hbm [resolvable:$true] %s98_s1 }
  0x19   :  { %s42_s21 = sshll.u32 %s3717_s23, 4  ;;  %s72_s26 = sshll.u32 %s2434_s25, 4  ;;  %s43_s21 = int_to_ptr.hbm [resolvable:$true] %s42_s21  ;;  %s73_s26 = int_to_ptr.vmem [resolvable:$true] %s72_s26 }
  0x1a   :  { %50 = dma.hbm_to_vmem [thread:$0]  %s43_s21, 8192, %s45_s3, [#allocation3], %s3719_s28, %s3719_s28, %s3718_s27  }
  0x1b   :  { %78 = dma.hbm_to_vmem [thread:$0]  %s71_s22, 1024, %s73_s26, [#allocation8], %s2430_s0, %s2430_s0, %s2431_s19  }
  0x1c   :  { %s126_s23 = sshll.u32 %s3699_s10, 4  ;;  %s2435_s8 = smov [#allocation12]   ;;  %s127_s23 = int_to_ptr.hbm [resolvable:$true] %s126_s23 }
  0x1d   :  { %s100_s4 = sshll.u32 %s2435_s8, 4  ;;  %s2436_s21 = smov [#allocation15]   ;;  %s101_s4 = int_to_ptr.vmem [resolvable:$true] %s100_s4 }
  0x1e   :  { %106 = dma.hbm_to_vmem [thread:$0]  %s99_s1, 1536, %s101_s4, [#allocation11], %s3719_s28, %s3719_s28, %s3718_s27  }
  0x1f   :  { %s128_s3 = sshll.u32 %s2436_s21, 4  ;;  %s129_s3 = int_to_ptr.vmem [resolvable:$true] %s128_s3 }
  0x20   :  { %134 = dma.hbm_to_vmem [thread:$0]  %s127_s23, 1536, %s129_s3, [#allocation14], %s3719_s28, %s3719_s28, %s3718_s27  }
  0x21   :  { %2413 = dma.done.wait [#allocation5], 16  }
  0x22   :  { %2414 = vsyncadd [#allocation5], 4294967280 }
  0x23   :  { %2415 = dma.done.wait [#allocation3], 8192  }
  0x24   :  { %2416 = vsyncadd [#allocation3], 4294959104 }
  0x25   :  { %2417 = dma.done.wait [#allocation8], 2048  }
  0x26   :  { %2418 = vsyncadd [#allocation8], 4294965248 }
  0x27   :  { %2419 = dma.done.wait [#allocation11], 2560  }
  0x28   :  { %2420 = vsyncadd [#allocation11], 4294964736 }
  0x29   :  { %2421 = dma.done.wait [#allocation14], 2048  }
  0x2a   :  { %2422 = vsyncadd [#allocation14], 4294965248 }
  0x2b   :  { %181 = sfence }
  0x2c   :  { %v2573_v0 = vld [vmem:[#allocation7 + $0x38] sm:$0xff]  ;;  %v2575_v1 = vld [vmem:[#allocation7 + $0x30] sm:$0xff]  ;;  %s186_s7 = sld [smem:[#allocation2]]  ;;  %v2579_v2 = vld [vmem:[#allocation7 + $0x28] sm:$0xff]  ;;  %vm433_vm0 = vcmask 523264   ;;  %vm838_vm1 = vcmask 785408  }
  0x2d   :  { %454 = vmatpush.msra.mxu0 %v2573_v0  ;;  %s2101_s10 = sld [smem:[#allocation2 + $0x1]]  ;;  %495 = vmatpush.msra.mxu1 %v2573_v0  ;;  %v2587_v3 = vld [vmem:[#allocation7 + $0x20] sm:$0xff]  ;;  %v2597_v6 = vld [vmem:[#allocation7 + $0x18] sm:$0xff]  ;;  %v2615_v13 = vld [vmem:[#allocation7 + $0x10] sm:$0xff]  ;;  %vm1497_vm2 = vcmask 261120   ;;  %vm2076_vm3 = vcmask 1042432  }
  0x2e   :  { %s2102_s22 = sld [smem:[#allocation2 + $0x2]]  ;;  %544 = vmatpush.msra.mxu2 %v2573_v0  ;;  %593 = vmatpush.msra.mxu3 %v2573_v0  ;;  %v187_v4 = vld [vmem:[#allocation6] sm:$0xff]  ;;  %v188_v17 = vld [vmem:[#allocation6 + $0x8] sm:$0xff]  ;;  %vm2077_vm4 = vcmask 260100   ;;  %vm2073_vm5 = vcmask 1043456  }
  0x2f   :  { %455 = vmatpush.msra.mxu0 %v2575_v1  ;;  %s2584_s0 = sld [smem:[#allocation2 + $0x3]]  ;;  %496 = vmatpush.msra.mxu1 %v2575_v1  ;;  %v202_v5 = vld [vmem:[#allocation6 + $0x20] sm:$0xff]  ;;  %v203_v23 = vld [vmem:[#allocation6 + $0x28] sm:$0xff]  ;;  %vm2078_vm6 = vmor %vm2077_vm4, %vm2076_vm3 }
  0x30   :  { %s2589_s19 = sld [smem:[#allocation2 + $0x4]]  ;;  %545 = vmatpush.msra.mxu2 %v2575_v1  ;;  %594 = vmatpush.msra.mxu3 %v2575_v1  ;;  %v217_v9 = vld [vmem:[#allocation6 + $0x40] sm:$0xff]  ;;  %v218_v24 = vld [vmem:[#allocation6 + $0x48] sm:$0xff] }
  0x31   :  { %456 = vmatpush.msra.mxu0 %v2579_v2  ;;  %s2594_s24 = sld [smem:[#allocation2 + $0x5]]  ;;  %497 = vmatpush.msra.mxu1 %v2579_v2  ;;  %v232_v12 = vld [vmem:[#allocation6 + $0x60] sm:$0xff]  ;;  %v2636_v25 = vld [vmem:[#allocation7 + $0x8] sm:$0xff] }
  0x32   :  { %s3720_s28 = sld [smem:[#allocation25_spill]]  ;;  %v2602_v8 = vstv %s186_s7  ;;  %546 = vmatpush.msra.mxu2 %v2579_v2  ;;  %595 = vmatpush.msra.mxu3 %v2579_v2  ;;  %v247_v21 = vld [vmem:[#allocation6 + $0x80] sm:$0xff]  ;;  %v233_v29 = vld [vmem:[#allocation6 + $0x68] sm:$0xff] }
  0x33   :  { %s2604_s25 = sld [smem:[#allocation2 + $0x6]]  ;;  %457 = vmatpush.msra.mxu0 %v2587_v3  ;;  %v192_v10 = vmul.f32 %v2602_v8, %v187_v4  ;;  %v2610_v11 = vstv %s2101_s10  ;;  %498 = vmatpush.msra.mxu1 %v2587_v3  ;;  %v193_v22 = vmul.f32 %v2602_v8, %v188_v17  ;;  %v262_v31 = vld [vmem:[#allocation6 + $0xa0] sm:$0xff]  ;;  %v248_v37 = vld [vmem:[#allocation6 + $0x88] sm:$0xff] }
  0x34   :  { %s2612_s26 = sld [smem:[#allocation2 + $0x7]]  ;;  %v207_v14 = vmul.f32 %v2610_v11, %v202_v5  ;;  %v2618_v15 = vstv %s2102_s22  ;;  %547 = vmatpush.msra.mxu2 %v2587_v3  ;;  %596 = vmatpush.msra.mxu3 %v2587_v3  ;;  %v208_v28 = vmul.f32 %v2610_v11, %v203_v23  ;;  %v2653_v35 = vld [vmem:[#allocation7] sm:$0xff]  ;;  %v263_v44 = vld [vmem:[#allocation6 + $0xa8] sm:$0xff] }
  0x35   :  { %s2620_s30 = sld [smem:[#allocation2 + $0x8]]  ;;  %458 = vmatpush.msra.mxu0 %v2597_v6  ;;  %v222_v19 = vmul.f32 %v2618_v15, %v217_v9  ;;  %v2630_v20 = vstv %s2584_s0  ;;  %499 = vmatpush.msra.mxu1 %v2597_v6  ;;  %v223_v34 = vmul.f32 %v2618_v15, %v218_v24  ;;  %v277_v39 = vld [vmem:[#allocation6 + $0xc0] sm:$0xff]  ;;  %v278_v52 = vld [vmem:[#allocation6 + $0xc8] sm:$0xff]  ;;  %v204_v9 = vld [vmem:[#allocation6 + $0x30] sm:$0xff] }
  0x36   :  { %s2632_s2 = sld [smem:[#allocation2 + $0x9]]  ;;  %v237_v26 = vmul.f32 %v2630_v20, %v232_v12  ;;  %v2640_v27 = vstv %s2589_s19  ;;  %548 = vmatpush.msra.mxu2 %v2597_v6  ;;  %597 = vmatpush.msra.mxu3 %v2597_v6  ;;  %v238_v42 = vmul.f32 %v2630_v20, %v233_v29  ;;  %v292_v49 = vld [vmem:[#allocation6 + $0xe0] sm:$0xff]  ;;  %v293_v59 = vld [vmem:[#allocation6 + $0xe8] sm:$0xff] }
  0x37   :  { %459 = vmatpush.msra.mxu0 %v2615_v13  ;;  %v2647_v32 = vstv %s2594_s24  ;;  %s2649_s20 = sld [smem:[#allocation2 + $0xa]]  ;;  %500 = vmatpush.msra.mxu1 %v2615_v13  ;;  %v252_v36 = vmul.f32 %v2640_v27, %v247_v21  ;;  %v253_v47 = vmul.f32 %v2640_v27, %v248_v37  ;;  %v307_v54 = vld [vmem:[#allocation6 + $0x100] sm:$0xff]  ;;  %v308_v4 = vld [vmem:[#allocation6 + $0x108] sm:$0xff] }
  0x38   :  { %v182_v7 = vld [vmem:[%s3720_s28] sm:$0xff]  ;;  %v183_v16 = vld [vmem:[%s3720_s28 + $0x8] sm:$0xff]  ;;  %s2656_s23 = sld [smem:[#allocation2 + $0xb]]  ;;  %549 = vmatpush.msra.mxu2 %v2615_v13  ;;  %598 = vmatpush.msra.mxu3 %v2615_v13  ;;  %v267_v43 = vmul.f32 %v2647_v32, %v262_v31  ;;  %v268_v58 = vmul.f32 %v2647_v32, %v263_v44  ;;  %v184_v24 = vld [vmem:[%s3720_s28 + $0x10] sm:$0xff] }
  0x39   :  { %v196_v18 = vadd.f32 %v192_v10, %v182_v7  ;;  %v197_v33 = vadd.f32 %v193_v22, %v183_v16  ;;  %460 = vmatpush.msra.mxu0 %v2636_v25  ;;  %v2662_v40 = vstv %s2604_s25  ;;  %s2664_s8 = sld [smem:[#allocation2 + $0xc]]  ;;  %501 = vmatpush.msra.mxu1 %v2636_v25  ;;  %v322_v55 = vld [vmem:[#allocation6 + $0x120] sm:$0xff]  ;;  %v338_v31 = vld [vmem:[#allocation6 + $0x148] sm:$0xff] }
  0x3a   :  { %s2669_s4 = sld [smem:[#allocation2 + $0xd]]  ;;  %550 = vmatpush.msra.mxu2 %v2636_v25  ;;  %599 = vmatpush.msra.mxu3 %v2636_v25  ;;  %v282_v48 = vmul.f32 %v2662_v40, %v277_v39  ;;  %v2678_v50 = vstv %s2612_s26  ;;  %v283_v63 = vmul.f32 %v2662_v40, %v278_v52  ;;  %v337_v12 = vld [vmem:[#allocation6 + $0x140] sm:$0xff]  ;;  %v190_v52 = vld [vmem:[#allocation6 + $0x18] sm:$0xff] }
  0x3b   :  { %v211_v30 = vadd.f32 %v207_v14, %v196_v18  ;;  %v212_v41 = vadd.f32 %v208_v28, %v197_v33  ;;  %461 = vmatpush.msra.mxu0 %v2653_v35  ;;  %502 = vmatpush.msra.mxu1 %v2653_v35  ;;  %v2681_v51 = vstv %s2620_s30  ;;  %v297_v61 = vmul.f32 %v2678_v50, %v292_v49  ;;  %s2695_s21 = sld [smem:[#allocation2 + $0xe]]  ;;  %v323_v18 = vld [vmem:[#allocation6 + $0x128] sm:$0xff]  ;;  %v367_v29 = vld [vmem:[#allocation6 + $0x180] sm:$0xff] }
  0x3c   :  { %551 = vmatpush.msra.mxu2 %v2653_v35  ;;  %600 = vmatpush.msra.mxu3 %v2653_v35  ;;  %v2686_v56 = vstv %s2632_s2  ;;  %v312_v5 = vmul.f32 %v2681_v51, %v307_v54  ;;  %v298_v17 = vmul.f32 %v2678_v50, %v293_v59  ;;  %s2711_s3 = sld [smem:[#allocation2 + $0xf]]  ;;  %v313_v23 = vmul.f32 %v2681_v51, %v308_v4  ;;  %v205_v59 = vld [vmem:[#allocation6 + $0x38] sm:$0xff] }
  0x3d   :  { %v226_v38 = vadd.f32 %v222_v19, %v211_v30  ;;  %v227_v46 = vadd.f32 %v223_v34, %v212_v41  ;;  %642 = vmatpush.msrb.mxu0 %v2573_v0  ;;  %v327_v7 = vmul.f32 %v2686_v56, %v322_v55  ;;  %v189_v0 = vld [vmem:[#allocation6 + $0x10] sm:$0xff]  ;;  %v2698_v14 = vstv %s2649_s20  ;;  %v382_v30 = vld [vmem:[#allocation6 + $0x1a0] sm:$0xff]  ;;  %s2438_s20 = smov [#allocation16]  }
  0x3e   :  { %v2703_v19 = vstv %s2656_s23  ;;  %v194_v33 = vmul.f32 %v2602_v8, %v189_v0  ;;  %v209_v34 = vmul.f32 %v2610_v11, %v204_v9  ;;  %v328_v37 = vmul.f32 %v2686_v56, %v323_v18  ;;  %v383_v9 = vld [vmem:[#allocation6 + $0x1a8] sm:$0xff]  ;;  %s2087_s23 = sshll.u32 %s3707_s18, 4  ;;  %s2088_s23 = int_to_ptr.hbm [resolvable:$true] %s2087_s23 }
  0x3f   :  { %v241_v45 = vadd.f32 %v237_v26, %v226_v38  ;;  %v242_v57 = vadd.f32 %v238_v42, %v227_v46  ;;  %643 = vmatpush.msrb.mxu0 %v2575_v1  ;;  %v352_v1 = vld [vmem:[#allocation6 + $0x160] sm:$0xff]  ;;  %v2706_v21 = vstv %s2664_s8  ;;  %v219_v26 = vld [vmem:[#allocation6 + $0x50] sm:$0xff]  ;;  %v353_v42 = vld [vmem:[#allocation6 + $0x168] sm:$0xff]  ;;  %v343_v49 = vmul.f32 %v2698_v14, %v338_v31 }
  0x40   :  { %v2709_v22 = vstv %s2669_s4  ;;  %v234_v38 = vld [vmem:[#allocation6 + $0x70] sm:$0xff]  ;;  %v198_v44 = vadd.f32 %v194_v33, %v184_v24  ;;  %v250_v31 = vld [vmem:[#allocation6 + $0x98] sm:$0xff] }
  0x41   :  { %v256_v53 = vadd.f32 %v252_v36, %v241_v45  ;;  %v257_v62 = vadd.f32 %v253_v47, %v242_v57  ;;  %644 = vmatpush.msrb.mxu0 %v2579_v2  ;;  %v342_v36 = vmul.f32 %v2698_v14, %v337_v12  ;;  %v224_v45 = vmul.f32 %v2618_v15, %v219_v26  ;;  %v249_v46 = vld [vmem:[#allocation6 + $0x90] sm:$0xff]  ;;  %v412_v26 = vld [vmem:[#allocation6 + $0x1e0] sm:$0xff] }
  0x42   :  { %v357_v47 = vmul.f32 %v2703_v19, %v352_v1  ;;  %v213_v55 = vadd.f32 %v209_v34, %v198_v44  ;;  %v239_v57 = vmul.f32 %v2630_v20, %v234_v38  ;;  %v254_v4 = vmul.f32 %v2640_v27, %v249_v46  ;;  %v279_v12 = vld [vmem:[#allocation6 + $0xd0] sm:$0xff] }
  0x43   :  { %v271_v60 = vadd.f32 %v267_v43, %v256_v53  ;;  %v272_v16 = vadd.f32 %v268_v58, %v257_v62  ;;  %645 = vmatpush.msrb.mxu0 %v2587_v3  ;;  %v368_v43 = vld [vmem:[#allocation6 + $0x188] sm:$0xff]  ;;  %v372_v3 = vmul.f32 %v2706_v21, %v367_v29  ;;  %v264_v58 = vld [vmem:[#allocation6 + $0xb0] sm:$0xff]  ;;  %v358_v62 = vmul.f32 %v2703_v19, %v353_v42 }
  0x44   :  { %v269_v18 = vmul.f32 %v2647_v32, %v264_v58  ;;  %v210_v1 = vmul.f32 %v2610_v11, %v205_v59  ;;  %v284_v33 = vmul.f32 %v2662_v40, %v279_v12  ;;  %v309_v38 = vld [vmem:[#allocation6 + $0x110] sm:$0xff] }
  0x45   :  { %v286_v10 = vadd.f32 %v282_v48, %v271_v60  ;;  %v287_v2 = vadd.f32 %v283_v63, %v272_v16  ;;  %646 = vmatpush.msrb.mxu0 %v2597_v6  ;;  %v387_v48 = vmul.f32 %v2709_v22, %v382_v30  ;;  %v220_v60 = vld [vmem:[#allocation6 + $0x58] sm:$0xff]  ;;  %v397_v6 = vld [vmem:[#allocation6 + $0x1c0] sm:$0xff]  ;;  %v373_v63 = vmul.f32 %v2706_v21, %v368_v43  ;;  %v294_v30 = vld [vmem:[#allocation6 + $0xf0] sm:$0xff] }
  0x46   :  { %v235_v16 = vld [vmem:[#allocation6 + $0x78] sm:$0xff]  ;;  %v299_v43 = vmul.f32 %v2678_v50, %v294_v30  ;;  %v339_v59 = vld [vmem:[#allocation6 + $0x150] sm:$0xff] }
  0x47   :  { %v301_v28 = vadd.f32 %v297_v61, %v286_v10  ;;  %v302_v41 = vadd.f32 %v298_v17, %v287_v2  ;;  %647 = vmatpush.msrb.mxu0 %v2615_v13  ;;  %v2731_v61 = vstv %s2695_s21  ;;  %v228_v10 = vadd.f32 %v224_v45, %v213_v55  ;;  %v369_v12 = vld [vmem:[#allocation6 + $0x190] sm:$0xff] }
  0x48   :  { %v195_v13 = vmul.f32 %v2602_v8, %v190_v52  ;;  %v2742_v17 = vstv %s2711_s3  ;;  %v402_v8 = vmul.f32 %v2731_v61, %v397_v6  ;;  %v240_v34 = vmul.f32 %v2630_v20, %v235_v16 }
  0x49   :  { %v316_v39 = vadd.f32 %v312_v5, %v301_v28  ;;  %v317_v54 = vadd.f32 %v313_v23, %v302_v41  ;;  %v185_v5 = vld [vmem:[%s3720_s28 + $0x18] sm:$0xff]  ;;  %648 = vmatpush.msrb.mxu0 %v2636_v25  ;;  %v225_v23 = vmul.f32 %v2618_v15, %v220_v60  ;;  %v243_v29 = vadd.f32 %v239_v57, %v228_v10  ;;  %v398_v15 = vld [vmem:[#allocation6 + $0x1c8] sm:$0xff]  ;;  %v265_v41 = vld [vmem:[#allocation6 + $0xb8] sm:$0xff] }
  0x4a   :  { %v199_v2 = vadd.f32 %v195_v13, %v185_v5  ;;  %v388_v25 = vmul.f32 %v2709_v22, %v383_v9  ;;  %v417_v42 = vmul.f32 %v2742_v17, %v412_v26  ;;  %v403_v20 = vmul.f32 %v2731_v61, %v398_v15  ;;  %v413_v57 = vld [vmem:[#allocation6 + $0x1e8] sm:$0xff]  ;;  %v414_v15 = vld [vmem:[#allocation6 + $0x1f0] sm:$0xff] }
  0x4b   :  { %v331_v53 = vadd.f32 %v327_v7, %v316_v39  ;;  %v332_v0 = vadd.f32 %v328_v37, %v317_v54  ;;  %649 = vmatpush.msrb.mxu0 %v2653_v35  ;;  %v258_v37 = vadd.f32 %v254_v4, %v243_v29  ;;  %v255_v35 = vmul.f32 %v2640_v27, %v250_v31  ;;  %v340_v29 = vld [vmem:[#allocation6 + $0x158] sm:$0xff] }
  0x4c   :  { %v214_v39 = vadd.f32 %v210_v1, %v199_v2  ;;  %v270_v52 = vmul.f32 %v2647_v32, %v265_v41  ;;  %v418_v5 = vmul.f32 %v2742_v17, %v413_v57  ;;  %v344_v32 = vmul.f32 %v2698_v14, %v339_v59 }
  0x4d   :  { %v346_v7 = vadd.f32 %v342_v36, %v331_v53  ;;  %v347_v28 = vadd.f32 %v343_v49, %v332_v0  ;;  %v273_v46 = vadd.f32 %v269_v18, %v258_v37  ;;  %v280_v53 = vld [vmem:[#allocation6 + $0xd8] sm:$0xff]  ;;  %v374_v26 = vmul.f32 %v2706_v21, %v369_v12 }
  0x4e   :  { %v229_v49 = vadd.f32 %v225_v23, %v214_v39  ;;  %v285_v4 = vmul.f32 %v2662_v40, %v280_v53  ;;  %v310_v0 = vld [vmem:[#allocation6 + $0x118] sm:$0xff] }
  0x4f   :  { %v361_v24 = vadd.f32 %v357_v47, %v346_v7  ;;  %v362_v36 = vadd.f32 %v358_v62, %v347_v28  ;;  %v324_v47 = vld [vmem:[#allocation6 + $0x130] sm:$0xff]  ;;  %v288_v58 = vadd.f32 %v284_v33, %v273_v46  ;;  %v325_v18 = vld [vmem:[#allocation6 + $0x138] sm:$0xff] }
  0x50   :  { %v244_v60 = vadd.f32 %v240_v34, %v229_v49  ;;  %v329_v27 = vmul.f32 %v2686_v56, %v324_v47  ;;  %v354_v7 = vld [vmem:[#allocation6 + $0x170] sm:$0xff]  ;;  %v355_v33 = vld [vmem:[#allocation6 + $0x178] sm:$0xff] }
  0x51   :  { %v376_v11 = vadd.f32 %v372_v3, %v361_v24  ;;  %v377_v45 = vadd.f32 %v373_v63, %v362_v36  ;;  %v314_v3 = vmul.f32 %v2681_v51, %v309_v38  ;;  %v303_v62 = vadd.f32 %v299_v43, %v288_v58  ;;  %v384_v28 = vld [vmem:[#allocation6 + $0x1b0] sm:$0xff]  ;;  %v415_v49 = vld [vmem:[#allocation6 + $0x1f8] sm:$0xff] }
  0x52   :  { %v259_v63 = vadd.f32 %v255_v35, %v244_v60  ;;  %v359_v23 = vmul.f32 %v2703_v19, %v354_v7  ;;  %v315_v24 = vmul.f32 %v2681_v51, %v310_v0  ;;  %v389_v34 = vmul.f32 %v2709_v22, %v384_v28  ;;  %v370_v51 = vld [vmem:[#allocation6 + $0x198] sm:$0xff] }
  0x53   :  { %v391_v44 = vadd.f32 %v387_v48, %v376_v11  ;;  %v392_v55 = vadd.f32 %v388_v25, %v377_v45  ;;  %v295_v48 = vld [vmem:[#allocation6 + $0xf8] sm:$0xff]  ;;  %v318_v10 = vadd.f32 %v314_v3, %v303_v62  ;;  %v399_v25 = vld [vmem:[#allocation6 + $0x1d0] sm:$0xff]  ;;  %v345_v36 = vmul.f32 %v2698_v14, %v340_v29 }
  0x54   :  { %v274_v13 = vadd.f32 %v270_v52, %v259_v63  ;;  %v300_v16 = vmul.f32 %v2678_v50, %v295_v48  ;;  %v404_v38 = vmul.f32 %v2731_v61, %v399_v25  ;;  %v360_v41 = vmul.f32 %v2703_v19, %v355_v33  ;;  %v400_v45 = vld [vmem:[#allocation6 + $0x1d8] sm:$0xff] }
  0x55   :  { %v406_v54 = vadd.f32 %v402_v8, %v391_v44  ;;  %v407_v9 = vadd.f32 %v403_v20, %v392_v55  ;;  %v333_v1 = vadd.f32 %v329_v27, %v318_v10  ;;  %v330_v8 = vmul.f32 %v2686_v56, %v325_v18  ;;  %v385_v56 = vld [vmem:[#allocation6 + $0x1b8] sm:$0xff] }
  0x56   :  { %v289_v40 = vadd.f32 %v285_v4, %v274_v13  ;;  %v419_v43 = vmul.f32 %v2742_v17, %v414_v15  ;;  %v375_v44 = vmul.f32 %v2706_v21, %v370_v51  ;;  %v390_v47 = vmul.f32 %v2709_v22, %v385_v56  ;;  %v671_v15 = vld [vmem:[#allocation9] sm:$0xff] }
  0x57   :  { %v2759_v6 = vadd.f32 %v417_v42, %v406_v54  ;;  %v2770_v30 = vadd.f32 %v418_v5, %v407_v9  ;;  %v348_v2 = vadd.f32 %v344_v32, %v333_v1  ;;  %v405_v52 = vmul.f32 %v2731_v61, %v400_v45  ;;  %v680_v56 = vld [vmem:[%s3694_s5 + $0x8] sm:$0xff] }
  0x58   :  { %v304_v31 = vadd.f32 %v300_v16, %v289_v40  ;;  %v420_v53 = vmul.f32 %v2742_v17, %v415_v49  ;;  %v682_v49 = vld [vmem:[%s3694_s5 + $0x18] sm:$0xff] }
  0x59   :  { %2116 = vmatmul.msk.f32.vlgmr.msra.gmra.mxu0 %vm433_vm0, %v2759_v6  ;;  %v363_v50 = vadd.f32 %v359_v23, %v348_v2 }
  0x5a   :  { %v319_v11 = vadd.f32 %v315_v24, %v304_v31 }
  0x5b   :  { %v378_v37 = vadd.f32 %v374_v26, %v363_v50 }
  0x5c   :  { %v334_v39 = vadd.f32 %v330_v8, %v319_v11 }
  0x5d   :  { %v393_v42 = vadd.f32 %v389_v34, %v378_v37  ;;  %v679_v37 = vld [vmem:[%s3694_s5] sm:$0xff] }
  0x5e   :  { %v349_v35 = vadd.f32 %v345_v36, %v334_v39  ;;  %v673_v39 = vld [vmem:[#allocation9 + $0x10] sm:$0xff] }
  0x5f   :  { %v408_v14 = vadd.f32 %v404_v38, %v393_v42  ;;  %v2437_v38 = vmov 0   ;;  %v681_v42 = vld [vmem:[%s3694_s5 + $0x10] sm:$0xff]  ;;  %s2085_s5 = sshll.u32 %s2438_s20, 4  ;;  %s2086_s5 = int_to_ptr.vmem [resolvable:$true] %s2085_s5 }
  0x60   :  { %v364_v46 = vadd.f32 %v360_v41, %v349_v35  ;;  %2206 = vset.pattern.permute.xlu0 %v2437_v38  ;;  %2207 = vset.pattern.permute.xlu1 %v2437_v38 }
  0x61   :  { %2117 = vmatmul.msk.f32.gmra.mxu0 %vm433_vm0, %v2770_v30  ;;  %v423_v20 = vadd.f32 %v419_v43, %v408_v14  ;;  %685 = vperm.xlu0 %2206, %v679_v37   ;;  %v675_v43 = vld [vmem:[#allocation9 + $0x20] sm:$0xff] }
  0x62   :  { %v379_v3 = vadd.f32 %v375_v44, %v364_v46  ;;  %2208 = vset.pattern.permute.xlu2 %v2437_v38  ;;  %695 = vperm.xlu1 %2207, %v681_v42   ;;  %v1336_v44 = vld [vmem:[%s3702_s13] sm:$0xff] }
  0x64   :  { %v394_v19 = vadd.f32 %v390_v47, %v379_v3 }
  0x66   :  { %v409_v54 = vadd.f32 %v405_v52, %v394_v19  ;;  %v677_v52 = vld [vmem:[#allocation9 + $0x30] sm:$0xff] }
  0x68   :  { %v424_v55 = vadd.f32 %v420_v53, %v409_v54  ;;  %v1337_v54 = vld [vmem:[%s3702_s13 + $0x8] sm:$0xff] }
  0x69   :  { %2118 = vmatmul.msk.f32.gmra.mxu0 %vm433_vm0, %v423_v20  ;;  %690 = vperm.xlu0 %2206, %v680_v56  }
  0x6a   :  { %700 = vperm.xlu1 %2207, %v682_v49  }
  0x71   :  { %2119 = vmatmul.msk.f32.gmra.mxu0 %vm433_vm0, %v424_v55  ;;  %1340 = vperm.xlu0 %2206, %v1336_v44  }
  0x72   :  { %1345 = vperm.xlu1 %2207, %v1337_v54  }
  0xd6   :  { %v463_v21 = vpop.f32.mrf.mxu0 }
  0xd7   :  { %2120 = vmatmul.msk.f32.vlgmr.msra.gmra.mxu1 %vm433_vm0, %v463_v21 }
  0xde   :  { %v466_v57 = vpop.f32.mrf.mxu0 }
  0xdf   :  { %2121 = vmatmul.msk.f32.gmra.mxu1 %vm433_vm0, %v466_v57 }
  0xe6   :  { %v469_v22 = vpop.f32.mrf.mxu0 }
  0xe7   :  { %2122 = vmatmul.msk.f32.gmra.mxu1 %vm433_vm0, %v469_v22 }
  0xee   :  { %v472_v58 = vpop.f32.mrf.mxu0 }
  0xef   :  { %2123 = vmatmul.msk.f32.gmra.mxu1 %vm433_vm0, %v472_v58 }
 0x154   :  { %v504_v61 = vpop.f32.mrf.mxu1 }
 0x155   :  { %v516_v59 = vmul.f32 2.0, %v504_v61  ;;  %v783_v61 = vld [vmem:[#allocation10 + $0x30] sm:$0xff] }
 0x157   :  { %v520_v17 = vsub.f32 %v516_v59, %v2759_v6  ;;  %v782_v59 = vld [vmem:[#allocation10 + $0x28] sm:$0xff] }
 0x159   :  { %2124 = vmatmul.msk.f32.vlgmr.msra.gmra.mxu2 %vm433_vm0, %v520_v17 }
 0x15c   :  { %v507_v60 = vpop.f32.mrf.mxu1 }
 0x15d   :  { %v517_v27 = vmul.f32 2.0, %v507_v60  ;;  %v780_v60 = vld [vmem:[#allocation10 + $0x18] sm:$0xff] }
 0x15f   :  { %v521_v48 = vsub.f32 %v517_v27, %v2770_v30  ;;  %v779_v27 = vld [vmem:[#allocation10 + $0x10] sm:$0xff] }
 0x161   :  { %2125 = vmatmul.msk.f32.gmra.mxu2 %vm433_vm0, %v521_v48 }
 0x164   :  { %v510_v62 = vpop.f32.mrf.mxu1 }
 0x165   :  { %v518_v63 = vmul.f32 2.0, %v510_v62  ;;  %v777_v62 = vld [vmem:[#allocation10] sm:$0xff] }
 0x167   :  { %v522_v4 = vsub.f32 %v518_v63, %v423_v20 }
 0x169   :  { %2126 = vmatmul.msk.f32.gmra.mxu2 %vm433_vm0, %v522_v4 }
 0x16c   :  { %v513_v5 = vpop.f32.mrf.mxu1 }
 0x16d   :  { %v519_v32 = vmul.f32 2.0, %v513_v5 }
 0x16f   :  { %v523_v7 = vsub.f32 %v519_v32, %v424_v55  ;;  %v2843_v32 = vld [vmem:[#allocation12 + $0x58] sm:$0xff] }
 0x170   :  { %855 = vmatpush.msra.mxu0 %v2843_v32 }
 0x171   :  { %2127 = vmatmul.msk.f32.gmra.mxu2 %vm433_vm0, %v523_v7 }
 0x1dc   :  { %v553_v0 = vpop.f32.mrf.mxu2 }
 0x1dd   :  { %v565_v9 = vmul.f32 2.0, %v553_v0  ;;  %v2849_v0 = vld [vmem:[#allocation12 + $0x48] sm:$0xff] }
 0x1df   :  { %v2796_v10 = vsub.f32 %v565_v9, %v463_v21 }
 0x1e1   :  { %2128 = vmatmul.msk.f32.vlgmr.msra.gmra.mxu3 %vm433_vm0, %v2796_v10 }
 0x1e4   :  { %v556_v12 = vpop.f32.mrf.mxu2 }
 0x1e5   :  { %v566_v13 = vmul.f32 2.0, %v556_v12 }
 0x1e7   :  { %v2800_v16 = vsub.f32 %v566_v13, %v466_v57  ;;  %v2855_v13 = vld [vmem:[#allocation12 + $0x40] sm:$0xff] }
 0x1e9   :  { %2129 = vmatmul.msk.f32.gmra.mxu3 %vm433_vm0, %v2800_v16 }
 0x1ec   :  { %v559_v18 = vpop.f32.mrf.mxu2 }
 0x1ed   :  { %v567_v1 = vmul.f32 2.0, %v559_v18  ;;  %v2861_v18 = vld [vmem:[#allocation12 + $0x38] sm:$0xff] }
 0x1ef   :  { %v2804_v23 = vsub.f32 %v567_v1, %v469_v22  ;;  %v2868_v1 = vld [vmem:[#allocation12 + $0x30] sm:$0xff] }
 0x1f1   :  { %2130 = vmatmul.msk.f32.gmra.mxu3 %vm433_vm0, %v2804_v23 }
 0x1f4   :  { %v562_v40 = vpop.f32.mrf.mxu2 }
 0x1f5   :  { %v568_v24 = vmul.f32 2.0, %v562_v40 }
 0x1f7   :  { %v572_v26 = vsub.f32 %v568_v24, %v472_v58  ;;  %v831_v24 = vld [vmem:[#allocation12 + $0x28] sm:$0xff] }
 0x1f9   :  { %2131 = vmatmul.msk.f32.gmra.mxu3 %vm433_vm0, %v572_v26  ;;  %715 = vmatpush.msrb.mxu1 %v572_v26 }
 0x1fb   :  { %716 = vmatpush.msrb.mxu1 %v2804_v23 }
 0x1fd   :  { %717 = vmatpush.msrb.mxu1 %v2800_v16 }
 0x1ff   :  { %718 = vmatpush.msrb.mxu1 %v2796_v10 }
 0x201   :  { %719 = vmatpush.msrb.mxu1 %v523_v7 }
 0x203   :  { %720 = vmatpush.msrb.mxu1 %v522_v4 }
 0x205   :  { %721 = vmatpush.msrb.mxu1 %v521_v48 }
 0x207   :  { %722 = vmatpush.msrb.mxu1 %v520_v17 }
 0x209   :  { %723 = vmatpush.msrb.mxu1 %v472_v58  ;;  %v784_v58 = vld [vmem:[#allocation10 + $0x38] sm:$0xff] }
 0x20a   :  { %805 = vmatpush.msrb.mxu3 %v784_v58 }
 0x20b   :  { %724 = vmatpush.msrb.mxu1 %v469_v22  ;;  %v678_v22 = vld [vmem:[#allocation9 + $0x38] sm:$0xff] }
 0x20c   :  { %806 = vmatpush.msrb.mxu3 %v783_v61 }
 0x20d   :  { %725 = vmatpush.msrb.mxu1 %v466_v57  ;;  %v676_v57 = vld [vmem:[#allocation9 + $0x28] sm:$0xff] }
 0x20e   :  { %807 = vmatpush.msrb.mxu3 %v782_v59 }
 0x20f   :  { %726 = vmatpush.msrb.mxu1 %v463_v21  ;;  %v674_v21 = vld [vmem:[#allocation9 + $0x18] sm:$0xff] }
 0x211   :  { %727 = vmatpush.msrb.mxu1 %v424_v55  ;;  %v672_v55 = vld [vmem:[#allocation9 + $0x8] sm:$0xff] }
 0x213   :  { %728 = vmatpush.msrb.mxu1 %v423_v20 }
 0x215   :  { %729 = vmatpush.msrb.mxu1 %v2770_v30 }
 0x217   :  { %730 = vmatpush.msrb.mxu1 %v2759_v6 }
 0x218   :  { %731 = vmatmul.f32.vlgmr.msrb.gmra.mxu1 %v671_v15 }
 0x219   :  { %896 = vmatpush.msra.mxu1 %v2843_v32 }
 0x220   :  { %734 = vmatmul.f32.gmra.mxu1 %v673_v39 }
 0x228   :  { %737 = vmatmul.f32.gmra.mxu1 %v675_v43 }
 0x230   :  { %740 = vmatmul.f32.gmra.mxu1 %v677_v52 }
 0x264   :  { %v602_v28 = vpop.f32.mrf.mxu3 }
 0x265   :  { %v614_v29 = vmul.f32 2.0, %v602_v28 }
 0x267   :  { %v618_v2 = vsub.f32 %v614_v29, %v520_v17  ;;  %v781_v17 = vld [vmem:[#allocation10 + $0x20] sm:$0xff] }
 0x268   :  { %808 = vmatpush.msrb.mxu3 %v781_v17  ;;  %v830_v29 = vld [vmem:[#allocation12 + $0x20] sm:$0xff] }
 0x269   :  { %2132 = vmatmul.msk.f32.vlgmr.msrb.gmra.mxu0 %vm433_vm0, %v618_v2 }
 0x26a   :  { %809 = vmatpush.msrb.mxu3 %v780_v60 }
 0x26c   :  { %v605_v31 = vpop.f32.mrf.mxu3  ;;  %810 = vmatpush.msrb.mxu3 %v779_v27 }
 0x26d   :  { %v615_v8 = vmul.f32 2.0, %v605_v31 }
 0x26f   :  { %v619_v25 = vsub.f32 %v615_v8, %v521_v48  ;;  %v778_v48 = vld [vmem:[#allocation10 + $0x8] sm:$0xff]  ;;  %v829_v8 = vld [vmem:[#allocation12 + $0x18] sm:$0xff] }
 0x270   :  { %811 = vmatpush.msrb.mxu3 %v778_v48 }
 0x271   :  { %2133 = vmatmul.msk.f32.gmra.mxu0 %vm433_vm0, %v619_v25 }
 0x272   :  { %812 = vmatpush.msrb.mxu3 %v777_v62 }
 0x274   :  { %v608_v33 = vpop.f32.mrf.mxu3  ;;  %994 = vmatpush.msra.mxu3 %v2843_v32 }
 0x275   :  { %v616_v50 = vmul.f32 2.0, %v608_v33 }
 0x277   :  { %v620_v34 = vsub.f32 %v616_v50, %v522_v4  ;;  %v686_v4 = vpop.permute.xlu0 %685  ;;  %v828_v50 = vld [vmem:[#allocation12 + $0x10] sm:$0xff] }
 0x279   :  { %2134 = vmatmul.msk.f32.gmra.mxu0 %vm433_vm0, %v620_v34 }
 0x27c   :  { %v611_v11 = vpop.f32.mrf.mxu3 }
 0x27d   :  { %v617_v36 = vmul.f32 2.0, %v611_v11 }
 0x27f   :  { %v621_v30 = vsub.f32 %v617_v36, %v523_v7  ;;  %v2845_v7 = vld [vmem:[#allocation12 + $0x50] sm:$0xff] }
 0x280   :  { %856 = vmatpush.msra.mxu0 %v2845_v7  ;;  %897 = vmatpush.msra.mxu1 %v2845_v7 }
 0x281   :  { %2135 = vmatmul.msk.f32.gmra.mxu0 %vm433_vm0, %v621_v30  ;;  %995 = vmatpush.msra.mxu3 %v2845_v7 }
 0x282   :  { %857 = vmatpush.msra.mxu0 %v2849_v0  ;;  %898 = vmatpush.msra.mxu1 %v2849_v0 }
 0x283   :  { %996 = vmatpush.msra.mxu3 %v2849_v0 }
 0x284   :  { %858 = vmatpush.msra.mxu0 %v2855_v13  ;;  %899 = vmatpush.msra.mxu1 %v2855_v13 }
 0x285   :  { %997 = vmatpush.msra.mxu3 %v2855_v13 }
 0x286   :  { %859 = vmatpush.msra.mxu0 %v2861_v18  ;;  %900 = vmatpush.msra.mxu1 %v2861_v18 }
 0x287   :  { %998 = vmatpush.msra.mxu3 %v2861_v18 }
 0x288   :  { %860 = vmatpush.msra.mxu0 %v2868_v1  ;;  %901 = vmatpush.msra.mxu1 %v2868_v1 }
 0x289   :  { %999 = vmatpush.msra.mxu3 %v2868_v1 }
 0x28a   :  { %861 = vmatpush.msra.mxu0 %v831_v24  ;;  %902 = vmatpush.msra.mxu1 %v831_v24 }
 0x28b   :  { %1000 = vmatpush.msra.mxu3 %v831_v24 }
 0x28c   :  { %862 = vmatpush.msra.mxu0 %v830_v29  ;;  %903 = vmatpush.msra.mxu1 %v830_v29 }
 0x28d   :  { %1001 = vmatpush.msra.mxu3 %v830_v29 }
 0x28e   :  { %863 = vmatpush.msra.mxu0 %v829_v8  ;;  %904 = vmatpush.msra.mxu1 %v829_v8 }
 0x28f   :  { %1002 = vmatpush.msra.mxu3 %v829_v8 }
 0x290   :  { %864 = vmatpush.msra.mxu0 %v828_v50  ;;  %905 = vmatpush.msra.mxu1 %v828_v50 }
 0x291   :  { %1003 = vmatpush.msra.mxu3 %v828_v50 }
 0x295   :  { %v732_v63 = vpop.f32.mrf.mxu1 }
 0x296   :  { %v733_v5 = vadd.f32 %v732_v63, %v686_v4 }
 0x29d   :  { %v735_v9 = vpop.f32.mrf.mxu1 }
 0x2e6   :  { %v651_v6 = vpop.f32.mrf.mxu0 }
 0x2e7   :  { %v663_v20 = vmul.f32 2.0, %v651_v6 }
 0x2e9   :  { %v667_v53 = vsub.f32 %v663_v20, %v2796_v10 }
 0x2ee   :  { %v654_v51 = vpop.f32.mrf.mxu0 }
 0x2ef   :  { %v664_v46 = vmul.f32 2.0, %v654_v51 }
 0x2f1   :  { %v668_v19 = vsub.f32 %v664_v46, %v2800_v16 }
 0x2f6   :  { %v657_v41 = vpop.f32.mrf.mxu0 }
 0x2f7   :  { %v665_v45 = vmul.f32 2.0, %v657_v41  ;;  %v826_v41 = vld [vmem:[#allocation12] sm:$0xff] }
 0x2f9   :  { %v669_v3 = vsub.f32 %v665_v45, %v2804_v23  ;;  %v691_v23 = vpop.permute.xlu0 %690 }
 0x2fa   :  { %v736_v40 = vadd.f32 %v735_v9, %v691_v23 }
 0x2fe   :  { %v660_v35 = vpop.f32.mrf.mxu0 }
 0x2ff   :  { %v666_v14 = vmul.f32 2.0, %v660_v35 }
 0x301   :  { %v670_v47 = vsub.f32 %v666_v14, %v572_v26 }
 0x303   :  { %752 = vmatpush.msrb.mxu2 %v670_v47 }
 0x305   :  { %753 = vmatpush.msrb.mxu2 %v669_v3 }
 0x307   :  { %754 = vmatpush.msrb.mxu2 %v668_v19 }
 0x309   :  { %755 = vmatpush.msrb.mxu2 %v667_v53 }
 0x30b   :  { %756 = vmatpush.msrb.mxu2 %v621_v30 }
 0x30d   :  { %757 = vmatpush.msrb.mxu2 %v620_v34  ;;  %v827_v34 = vld [vmem:[#allocation12 + $0x8] sm:$0xff] }
 0x30e   :  { %865 = vmatpush.msra.mxu0 %v827_v34  ;;  %906 = vmatpush.msra.mxu1 %v827_v34 }
 0x30f   :  { %758 = vmatpush.msrb.mxu2 %v619_v25  ;;  %v696_v25 = vpop.permute.xlu1 %695  ;;  %1004 = vmatpush.msra.mxu3 %v827_v34 }
 0x310   :  { %866 = vmatpush.msra.mxu0 %v826_v41  ;;  %907 = vmatpush.msra.mxu1 %v826_v41 }
 0x311   :  { %759 = vmatpush.msrb.mxu2 %v618_v2  ;;  %v738_v2 = vpop.f32.mrf.mxu1  ;;  %1005 = vmatpush.msra.mxu3 %v826_v41 }
 0x312   :  { %2136 = vmatmul.msk.f32.vlgmr.msrb.gmra.mxu2 %vm433_vm0, %v672_v55  ;;  %v739_v33 = vadd.f32 %v738_v2, %v696_v25  ;;  %1043 = vmatpush.msrb.mxu0 %v2843_v32  ;;  %v1078_v2 = vld [vmem:[#allocation13 + $0x10] sm:$0xff]  ;;  %v1157_v25 = vld [vmem:[#allocation15 + $0x58] sm:$0xff] }
 0x313   :  { %945 = vmatpush.msra.mxu2 %v2843_v32 }
 0x314   :  { %1044 = vmatpush.msrb.mxu0 %v2845_v7 }
 0x315   :  { %946 = vmatpush.msra.mxu2 %v2845_v7 }
 0x316   :  { %1045 = vmatpush.msrb.mxu0 %v2849_v0 }
 0x317   :  { %947 = vmatpush.msra.mxu2 %v2849_v0  ;;  %v701_v15 = vpop.permute.xlu1 %700 }
 0x318   :  { %1046 = vmatpush.msrb.mxu0 %v2855_v13 }
 0x319   :  { %948 = vmatpush.msra.mxu2 %v2855_v13  ;;  %v741_v6 = vpop.f32.mrf.mxu1 }
 0x31a   :  { %2137 = vmatmul.msk.f32.gmra.mxu2 %vm433_vm0, %v674_v21  ;;  %v742_v51 = vadd.f32 %v741_v6, %v701_v15  ;;  %1047 = vmatpush.msrb.mxu0 %v2861_v18  ;;  %v1081_v6 = vld [vmem:[%s3698_s9 + $0x8] sm:$0xff] }
 0x31b   :  { %949 = vmatpush.msra.mxu2 %v2861_v18 }
 0x31c   :  { %1048 = vmatpush.msrb.mxu0 %v2868_v1 }
 0x31d   :  { %950 = vmatpush.msra.mxu2 %v2868_v1 }
 0x31e   :  { %1049 = vmatpush.msrb.mxu0 %v831_v24 }
 0x31f   :  { %951 = vmatpush.msra.mxu2 %v831_v24 }
 0x320   :  { %1050 = vmatpush.msrb.mxu0 %v830_v29 }
 0x321   :  { %952 = vmatpush.msra.mxu2 %v830_v29 }
 0x322   :  { %2138 = vmatmul.msk.f32.gmra.mxu2 %vm433_vm0, %v676_v57  ;;  %1051 = vmatpush.msrb.mxu0 %v829_v8 }
 0x323   :  { %953 = vmatpush.msra.mxu2 %v829_v8  ;;  %v1080_v8 = vld [vmem:[%s3698_s9] sm:$0xff] }
 0x324   :  { %1052 = vmatpush.msrb.mxu0 %v828_v50  ;;  %1084 = vperm.xlu2 %2208, %v1080_v8  }
 0x325   :  { %954 = vmatpush.msra.mxu2 %v828_v50  ;;  %v1155_v50 = vld [vmem:[#allocation15 + $0x48] sm:$0xff] }
 0x326   :  { %1053 = vmatpush.msrb.mxu0 %v827_v34 }
 0x327   :  { %955 = vmatpush.msra.mxu2 %v827_v34 }
 0x328   :  { %1054 = vmatpush.msrb.mxu0 %v826_v41 }
 0x329   :  { %956 = vmatpush.msra.mxu2 %v826_v41  ;;  %v1152_v41 = vld [vmem:[#allocation15 + $0x30] sm:$0xff] }
 0x32a   :  { %2139 = vmatmul.msk.f32.gmra.mxu2 %vm433_vm0, %v678_v22 }
 0x32c   :  { %1089 = vperm.xlu2 %2208, %v1081_v6  }
 0x395   :  { %v761_v10 = vpop.f32.mrf.mxu2 }
 0x396   :  { %v762_v12 = vadd.f32 %v761_v10, %v733_v5 }
 0x398   :  { %v773_v16 = vmax.f32 %v762_v12, 0.0 }
 0x39a   :  { %2140 = vmatmul.msk.f32.vlgmr.msrb.gmra.mxu3 %vm433_vm0, %v773_v16 }
 0x39b   :  { %1168 = vmatpush.msrb.mxu3 %v1157_v25 }
 0x39d   :  { %v764_v26 = vpop.f32.mrf.mxu2 }
 0x39e   :  { %v765_v28 = vadd.f32 %v764_v26, %v736_v40 }
 0x3a0   :  { %v774_v31 = vmax.f32 %v765_v28, 0.0  ;;  %v1076_v28 = vld [vmem:[#allocation13] sm:$0xff] }
 0x3a2   :  { %2141 = vmatmul.msk.f32.gmra.mxu3 %vm433_vm0, %v774_v31 }
 0x3a5   :  { %v767_v11 = vpop.f32.mrf.mxu2 }
 0x3a6   :  { %v768_v36 = vadd.f32 %v767_v11, %v739_v33  ;;  %v1156_v33 = vld [vmem:[#allocation15 + $0x50] sm:$0xff] }
 0x3a7   :  { %1169 = vmatpush.msrb.mxu3 %v1156_v33 }
 0x3a8   :  { %v775_v30 = vmax.f32 %v768_v36, 0.0 }
 0x3a9   :  { %1170 = vmatpush.msrb.mxu3 %v1155_v50 }
 0x3aa   :  { %2142 = vmatmul.msk.f32.gmra.mxu3 %vm433_vm0, %v775_v30  ;;  %v1154_v30 = vld [vmem:[#allocation15 + $0x40] sm:$0xff] }
 0x3ab   :  { %1171 = vmatpush.msrb.mxu3 %v1154_v30 }
 0x3ad   :  { %v770_v37 = vpop.f32.mrf.mxu2 }
 0x3ae   :  { %v771_v38 = vadd.f32 %v770_v37, %v742_v51  ;;  %v1153_v37 = vld [vmem:[#allocation15 + $0x38] sm:$0xff] }
 0x3af   :  { %1172 = vmatpush.msrb.mxu3 %v1153_v37 }
 0x3b0   :  { %v776_v39 = vmax.f32 %v771_v38, 0.0 }
 0x3b1   :  { %1173 = vmatpush.msrb.mxu3 %v1152_v41 }
 0x3b2   :  { %2143 = vmatmul.msk.f32.gmra.mxu3 %vm433_vm0, %v776_v39 }
 0x41d   :  { %v814_v56 = vpop.f32.mrf.mxu3 }
 0x41e   :  { %2144 = vmatmul.msk.f32.vlgmr.msra.gmra.mxu0 %vm838_vm1, %v814_v56 }
 0x425   :  { %v817_v42 = vpop.f32.mrf.mxu3 }
 0x426   :  { %2145 = vmatmul.msk.f32.gmra.mxu0 %vm838_vm1, %v817_v42 }
 0x42d   :  { %v820_v43 = vpop.f32.mrf.mxu3 }
 0x42e   :  { %2146 = vmatmul.msk.f32.gmra.mxu0 %vm838_vm1, %v820_v43 }
 0x435   :  { %v823_v35 = vpop.f32.mrf.mxu3 }
 0x436   :  { %2147 = vmatmul.msk.f32.gmra.mxu0 %vm838_vm1, %v823_v35 }
 0x49b   :  { %v868_v44 = vpop.f32.mrf.mxu0 }
 0x49c   :  { %2148 = vmatmul.msk.f32.vlgmr.msra.gmra.mxu1 %vm838_vm1, %v868_v44 }
 0x4a3   :  { %v871_v45 = vpop.f32.mrf.mxu0 }
 0x4a4   :  { %2149 = vmatmul.msk.f32.gmra.mxu1 %vm838_vm1, %v871_v45 }
 0x4ab   :  { %v874_v14 = vpop.f32.mrf.mxu0 }
 0x4ac   :  { %2150 = vmatmul.msk.f32.gmra.mxu1 %vm838_vm1, %v874_v14 }
 0x4b3   :  { %v877_v46 = vpop.f32.mrf.mxu0 }
 0x4b4   :  { %2151 = vmatmul.msk.f32.gmra.mxu1 %vm838_vm1, %v877_v46 }
 0x519   :  { %v909_v47 = vpop.f32.mrf.mxu1 }
 0x51a   :  { %v921_v49 = vmul.f32 2.0, %v909_v47  ;;  %v1148_v47 = vld [vmem:[#allocation15 + $0x10] sm:$0xff] }
 0x51c   :  { %v925_v20 = vsub.f32 %v921_v49, %v814_v56  ;;  %v1147_v49 = vld [vmem:[#allocation15 + $0x8] sm:$0xff] }
 0x51e   :  { %2152 = vmatmul.msk.f32.vlgmr.msra.gmra.mxu2 %vm838_vm1, %v925_v20 }
 0x521   :  { %v912_v3 = vpop.f32.mrf.mxu1 }
 0x522   :  { %v922_v52 = vmul.f32 2.0, %v912_v3  ;;  %v2938_v3 = vld [vmem:[%s3700_s11 + $0x78] sm:$0xff] }
 0x523   :  { %1203 = vmatpush.msra.mxu0 %v2938_v3 }
 0x524   :  { %v926_v19 = vsub.f32 %v922_v52, %v817_v42  ;;  %v2943_v52 = vld [vmem:[%s3700_s11 + $0x70] sm:$0xff] }
 0x525   :  { %1204 = vmatpush.msra.mxu0 %v2943_v52 }
 0x526   :  { %2153 = vmatmul.msk.f32.gmra.mxu2 %vm838_vm1, %v926_v19 }
 0x529   :  { %v915_v53 = vpop.f32.mrf.mxu1 }
 0x52a   :  { %v923_v54 = vmul.f32 2.0, %v915_v53  ;;  %v2959_v53 = vld [vmem:[%s3700_s11 + $0x60] sm:$0xff] }
 0x52c   :  { %v927_v55 = vsub.f32 %v923_v54, %v820_v43  ;;  %v2968_v54 = vld [vmem:[%s3700_s11 + $0x58] sm:$0xff] }
 0x52e   :  { %2154 = vmatmul.msk.f32.gmra.mxu2 %vm838_vm1, %v927_v55 }
 0x531   :  { %v918_v21 = vpop.f32.mrf.mxu1 }
 0x532   :  { %v924_v57 = vmul.f32 2.0, %v918_v21  ;;  %v2986_v21 = vld [vmem:[%s3700_s11 + $0x48] sm:$0xff] }
 0x534   :  { %v928_v22 = vsub.f32 %v924_v57, %v823_v35  ;;  %v2995_v57 = vld [vmem:[%s3700_s11 + $0x40] sm:$0xff] }
 0x536   :  { %2155 = vmatmul.msk.f32.gmra.mxu2 %vm838_vm1, %v928_v22 }
 0x5a1   :  { %v958_v58 = vpop.f32.mrf.mxu2 }
 0x5a2   :  { %v970_v61 = vmul.f32 2.0, %v958_v58  ;;  %v3004_v58 = vld [vmem:[%s3700_s11 + $0x38] sm:$0xff] }
 0x5a4   :  { %v2901_v59 = vsub.f32 %v970_v61, %v868_v44  ;;  %v1085_v61 = vpop.permute.xlu2 %1084 }
 0x5a6   :  { %2156 = vmatmul.msk.f32.vlgmr.msra.gmra.mxu3 %vm838_vm1, %v2901_v59 }
 0x5a9   :  { %v961_v17 = vpop.f32.mrf.mxu2 }
 0x5aa   :  { %v971_v60 = vmul.f32 2.0, %v961_v17  ;;  %v1193_v17 = vld [vmem:[%s3700_s11 + $0x30] sm:$0xff] }
 0x5ac   :  { %v2905_v27 = vsub.f32 %v971_v60, %v871_v45  ;;  %v1192_v60 = vld [vmem:[%s3700_s11 + $0x28] sm:$0xff] }
 0x5ae   :  { %2157 = vmatmul.msk.f32.gmra.mxu3 %vm838_vm1, %v2905_v27 }
 0x5b1   :  { %v964_v48 = vpop.f32.mrf.mxu2 }
 0x5b2   :  { %v972_v62 = vmul.f32 2.0, %v964_v48 }
 0x5b4   :  { %v2909_v63 = vsub.f32 %v972_v62, %v874_v14  ;;  %v1191_v62 = vld [vmem:[%s3700_s11 + $0x20] sm:$0xff] }
 0x5b6   :  { %2158 = vmatmul.msk.f32.gmra.mxu3 %vm838_vm1, %v2909_v63 }
 0x5b9   :  { %v967_v4 = vpop.f32.mrf.mxu2 }
 0x5ba   :  { %v973_v5 = vmul.f32 2.0, %v967_v4  ;;  %v1190_v4 = vld [vmem:[%s3700_s11 + $0x18] sm:$0xff] }
 0x5bc   :  { %v977_v32 = vsub.f32 %v973_v5, %v877_v46 }
 0x5be   :  { %2159 = vmatmul.msk.f32.gmra.mxu3 %vm838_vm1, %v977_v32  ;;  %1098 = vmatpush.msrb.mxu1 %v977_v32 }
 0x5c0   :  { %1099 = vmatpush.msrb.mxu1 %v2909_v63 }
 0x5c2   :  { %1100 = vmatpush.msrb.mxu1 %v2905_v27 }
 0x5c4   :  { %1101 = vmatpush.msrb.mxu1 %v2901_v59 }
 0x5c6   :  { %1102 = vmatpush.msrb.mxu1 %v928_v22 }
 0x5c8   :  { %1103 = vmatpush.msrb.mxu1 %v927_v55 }
 0x5ca   :  { %1104 = vmatpush.msrb.mxu1 %v926_v19 }
 0x5cc   :  { %1105 = vmatpush.msrb.mxu1 %v925_v20 }
 0x5ce   :  { %1106 = vmatpush.msrb.mxu1 %v877_v46  ;;  %v1149_v46 = vld [vmem:[#allocation15 + $0x18] sm:$0xff] }
 0x5d0   :  { %1107 = vmatpush.msrb.mxu1 %v874_v14  ;;  %v1079_v14 = vld [vmem:[#allocation13 + $0x18] sm:$0xff] }
 0x5d2   :  { %1108 = vmatpush.msrb.mxu1 %v871_v45  ;;  %v1077_v45 = vld [vmem:[#allocation13 + $0x8] sm:$0xff] }
 0x5d4   :  { %1109 = vmatpush.msrb.mxu1 %v868_v44  ;;  %v2021_v44 = vld [vmem:[%s3706_s17] sm:$0x7] }
 0x5d5   :  { %2024 = vperm.xlu2 %2208, %v2021_v44   ;;  %v1407_v44 = vld [vmem:[%s3703_s14 + $0xe0] sm:$0xff] }
 0x5d6   :  { %1110 = vmatpush.msrb.mxu1 %v823_v35  ;;  %v1150_v35 = vld [vmem:[#allocation15 + $0x20] sm:$0xff] }
 0x5d8   :  { %1111 = vmatpush.msrb.mxu1 %v820_v43 }
 0x5da   :  { %1112 = vmatpush.msrb.mxu1 %v817_v42  ;;  %v1151_v42 = vld [vmem:[#allocation15 + $0x28] sm:$0xff] }
 0x5db   :  { %1174 = vmatpush.msrb.mxu3 %v1151_v42 }
 0x5dc   :  { %1113 = vmatpush.msrb.mxu1 %v814_v56 }
 0x5dd   :  { %1114 = vmatmul.f32.vlgmr.msrb.gmra.mxu1 %v1076_v28  ;;  %1175 = vmatpush.msrb.mxu3 %v1150_v35  ;;  %v1410_v35 = vld [vmem:[%s3703_s14 + $0xf8] sm:$0xff] }
 0x5de   :  { %1226 = vmatpush.msra.mxu1 %v2938_v3 }
 0x5df   :  { %1176 = vmatpush.msrb.mxu3 %v1149_v46  ;;  %v1405_v46 = vld [vmem:[%s3703_s14 + $0xd0] sm:$0xff] }
 0x5e0   :  { %1227 = vmatpush.msra.mxu1 %v2943_v52 }
 0x5e1   :  { %1177 = vmatpush.msrb.mxu3 %v1148_v47  ;;  %v1406_v47 = vld [vmem:[%s3703_s14 + $0xd8] sm:$0xff] }
 0x5e3   :  { %1178 = vmatpush.msrb.mxu3 %v1147_v49  ;;  %v1403_v49 = vld [vmem:[%s3703_s14 + $0xc0] sm:$0xff] }
 0x5e5   :  { %1117 = vmatmul.f32.gmra.mxu1 %v1078_v2 }
 0x629   :  { %v1007_v7 = vpop.f32.mrf.mxu3 }
 0x62a   :  { %v1019_v0 = vmul.f32 2.0, %v1007_v7  ;;  %v1090_v7 = vpop.permute.xlu2 %1089 }
 0x62c   :  { %v1023_v9 = vsub.f32 %v1019_v0, %v925_v20  ;;  %v1146_v20 = vld [vmem:[#allocation15] sm:$0xff] }
 0x62d   :  { %1179 = vmatpush.msrb.mxu3 %v1146_v20  ;;  %v1404_v20 = vld [vmem:[%s3703_s14 + $0xc8] sm:$0xff] }
 0x62e   :  { %2160 = vmatmul.msk.f32.vlgmr.msrb.gmra.mxu0 %vm838_vm1, %v1023_v9 }
 0x62f   :  { %1280 = vmatpush.msra.mxu3 %v2938_v3 }
 0x631   :  { %v1010_v10 = vpop.f32.mrf.mxu3  ;;  %1281 = vmatpush.msra.mxu3 %v2943_v52 }
 0x632   :  { %v1020_v12 = vmul.f32 2.0, %v1010_v10 }
 0x634   :  { %v1024_v13 = vsub.f32 %v1020_v12, %v926_v19  ;;  %v2950_v19 = vld [vmem:[%s3700_s11 + $0x68] sm:$0xff] }
 0x635   :  { %1205 = vmatpush.msra.mxu0 %v2950_v19  ;;  %1228 = vmatpush.msra.mxu1 %v2950_v19 }
 0x636   :  { %2161 = vmatmul.msk.f32.gmra.mxu0 %vm838_vm1, %v1024_v13  ;;  %1282 = vmatpush.msra.mxu3 %v2950_v19 }
 0x637   :  { %1206 = vmatpush.msra.mxu0 %v2959_v53  ;;  %1229 = vmatpush.msra.mxu1 %v2959_v53 }
 0x638   :  { %1283 = vmatpush.msra.mxu3 %v2959_v53 }
 0x639   :  { %v1013_v16 = vpop.f32.mrf.mxu3  ;;  %1207 = vmatpush.msra.mxu0 %v2968_v54  ;;  %1230 = vmatpush.msra.mxu1 %v2968_v54 }
 0x63a   :  { %v1021_v18 = vmul.f32 2.0, %v1013_v16  ;;  %1284 = vmatpush.msra.mxu3 %v2968_v54  ;;  %v1187_v16 = vld [vmem:[%s3700_s11] sm:$0xff] }
 0x63c   :  { %v1025_v1 = vsub.f32 %v1021_v18, %v927_v55  ;;  %v2977_v55 = vld [vmem:[%s3700_s11 + $0x50] sm:$0xff] }
 0x63d   :  { %1208 = vmatpush.msra.mxu0 %v2977_v55  ;;  %1231 = vmatpush.msra.mxu1 %v2977_v55 }
 0x63e   :  { %2162 = vmatmul.msk.f32.gmra.mxu0 %vm838_vm1, %v1025_v1  ;;  %1285 = vmatpush.msra.mxu3 %v2977_v55 }
 0x63f   :  { %1209 = vmatpush.msra.mxu0 %v2986_v21  ;;  %1232 = vmatpush.msra.mxu1 %v2986_v21 }
 0x640   :  { %1286 = vmatpush.msra.mxu3 %v2986_v21 }
 0x641   :  { %v1016_v23 = vpop.f32.mrf.mxu3  ;;  %1210 = vmatpush.msra.mxu0 %v2995_v57  ;;  %1233 = vmatpush.msra.mxu1 %v2995_v57 }
 0x642   :  { %v1022_v40 = vmul.f32 2.0, %v1016_v23  ;;  %1287 = vmatpush.msra.mxu3 %v2995_v57 }
 0x643   :  { %1211 = vmatpush.msra.mxu0 %v3004_v58  ;;  %1234 = vmatpush.msra.mxu1 %v3004_v58 }
 0x644   :  { %v1026_v24 = vsub.f32 %v1022_v40, %v928_v22  ;;  %1288 = vmatpush.msra.mxu3 %v3004_v58 }
 0x645   :  { %1212 = vmatpush.msra.mxu0 %v1193_v17  ;;  %1235 = vmatpush.msra.mxu1 %v1193_v17 }
 0x646   :  { %2163 = vmatmul.msk.f32.gmra.mxu0 %vm838_vm1, %v1026_v24  ;;  %1289 = vmatpush.msra.mxu3 %v1193_v17 }
 0x647   :  { %1213 = vmatpush.msra.mxu0 %v1192_v60  ;;  %1236 = vmatpush.msra.mxu1 %v1192_v60 }
 0x648   :  { %1290 = vmatpush.msra.mxu3 %v1192_v60 }
 0x649   :  { %1214 = vmatpush.msra.mxu0 %v1191_v62  ;;  %1237 = vmatpush.msra.mxu1 %v1191_v62 }
 0x64a   :  { %1291 = vmatpush.msra.mxu3 %v1191_v62 }
 0x64b   :  { %1215 = vmatpush.msra.mxu0 %v1190_v4  ;;  %1238 = vmatpush.msra.mxu1 %v1190_v4 }
 0x64c   :  { %1292 = vmatpush.msra.mxu3 %v1190_v4 }
 0x65a   :  { %v1115_v22 = vpop.f32.mrf.mxu1 }
 0x662   :  { %v1118_v5 = vpop.f32.mrf.mxu1 }
 0x663   :  { %v1119_v0 = vadd.f32 %v1118_v5, %v1090_v7  ;;  %v1335_v5 = vld [vmem:[%s3701_s12 + $0x8] sm:$0xff] }
 0x664   :  { %v1384_v7 = vld [vmem:[%s3703_s14 + $0x28] sm:$0xff] }
 0x6ab   :  { %v1056_v26 = vpop.f32.mrf.mxu0 }
 0x6ac   :  { %v1068_v38 = vmul.f32 2.0, %v1056_v26 }
 0x6ae   :  { %v1072_v43 = vsub.f32 %v1068_v38, %v2901_v59  ;;  %v1116_v59 = vadd.f32 %v1115_v22, %v1085_v61  ;;  %v1393_v22 = vld [vmem:[%s3703_s14 + $0x70] sm:$0xff]  ;;  %v1391_v61 = vld [vmem:[%s3703_s14 + $0x60] sm:$0xff] }
 0x6b3   :  { %v1059_v29 = vpop.f32.mrf.mxu0 }
 0x6b4   :  { %v1069_v15 = vmul.f32 2.0, %v1059_v29 }
 0x6b6   :  { %v1073_v56 = vsub.f32 %v1069_v15, %v2905_v27 }
 0x6bb   :  { %v1062_v31 = vpop.f32.mrf.mxu0 }
 0x6bc   :  { %v1070_v11 = vmul.f32 2.0, %v1062_v31 }
 0x6be   :  { %v1074_v39 = vsub.f32 %v1070_v11, %v2909_v63 }
 0x6c3   :  { %v1065_v34 = vpop.f32.mrf.mxu0 }
 0x6c4   :  { %v1071_v36 = vmul.f32 2.0, %v1065_v34 }
 0x6c6   :  { %v1075_v51 = vsub.f32 %v1071_v36, %v977_v32  ;;  %v1189_v32 = vld [vmem:[%s3700_s11 + $0x10] sm:$0xff] }
 0x6c7   :  { %1216 = vmatpush.msra.mxu0 %v1189_v32  ;;  %1239 = vmatpush.msra.mxu1 %v1189_v32 }
 0x6c8   :  { %1129 = vmatpush.msrb.mxu2 %v1075_v51  ;;  %1293 = vmatpush.msra.mxu3 %v1189_v32 }
 0x6ca   :  { %1130 = vmatpush.msrb.mxu2 %v1074_v39 }
 0x6cc   :  { %1131 = vmatpush.msrb.mxu2 %v1073_v56 }
 0x6ce   :  { %1132 = vmatpush.msrb.mxu2 %v1072_v43  ;;  %v1409_v43 = vld [vmem:[%s3703_s14 + $0xf0] sm:$0xff] }
 0x6d0   :  { %1133 = vmatpush.msrb.mxu2 %v1026_v24 }
 0x6d2   :  { %1134 = vmatpush.msrb.mxu2 %v1025_v1 }
 0x6d4   :  { %1135 = vmatpush.msrb.mxu2 %v1024_v13 }
 0x6d6   :  { %1136 = vmatpush.msrb.mxu2 %v1023_v9  ;;  %v1188_v9 = vld [vmem:[%s3700_s11 + $0x8] sm:$0xff] }
 0x6d7   :  { %2164 = vmatmul.msk.f32.vlgmr.msrb.gmra.mxu2 %vm433_vm0, %v1077_v45  ;;  %1217 = vmatpush.msra.mxu0 %v1188_v9 }
 0x6d8   :  { %1253 = vmatpush.msra.mxu2 %v2938_v3  ;;  %1240 = vmatpush.msra.mxu1 %v1188_v9 }
 0x6d9   :  { %1294 = vmatpush.msra.mxu3 %v1188_v9  ;;  %1218 = vmatpush.msra.mxu0 %v1187_v16 }
 0x6da   :  { %1254 = vmatpush.msra.mxu2 %v2943_v52  ;;  %1241 = vmatpush.msra.mxu1 %v1187_v16 }
 0x6db   :  { %1295 = vmatpush.msra.mxu3 %v1187_v16  ;;  %1307 = vmatpush.msrb.mxu0 %v2938_v3  ;;  %v1401_v3 = vld [vmem:[%s3703_s14 + $0xb0] sm:$0xff] }
 0x6dc   :  { %1255 = vmatpush.msra.mxu2 %v2950_v19 }
 0x6dd   :  { %1308 = vmatpush.msrb.mxu0 %v2943_v52  ;;  %v1402_v52 = vld [vmem:[%s3703_s14 + $0xb8] sm:$0xff] }
 0x6de   :  { %1256 = vmatpush.msra.mxu2 %v2959_v53 }
 0x6df   :  { %2165 = vmatmul.msk.f32.gmra.mxu2 %vm433_vm0, %v1079_v14  ;;  %1309 = vmatpush.msrb.mxu0 %v2950_v19  ;;  %v1408_v14 = vld [vmem:[%s3703_s14 + $0xe8] sm:$0xff]  ;;  %v1399_v19 = vld [vmem:[%s3703_s14 + $0xa0] sm:$0xff] }
 0x6e0   :  { %1257 = vmatpush.msra.mxu2 %v2968_v54 }
 0x6e1   :  { %1310 = vmatpush.msrb.mxu0 %v2959_v53  ;;  %v1400_v53 = vld [vmem:[%s3703_s14 + $0xa8] sm:$0xff] }
 0x6e2   :  { %1258 = vmatpush.msra.mxu2 %v2977_v55 }
 0x6e3   :  { %1311 = vmatpush.msrb.mxu0 %v2968_v54  ;;  %v1397_v54 = vld [vmem:[%s3703_s14 + $0x90] sm:$0xff] }
 0x6e4   :  { %1259 = vmatpush.msra.mxu2 %v2986_v21 }
 0x6e5   :  { %1312 = vmatpush.msrb.mxu0 %v2977_v55  ;;  %v1398_v55 = vld [vmem:[%s3703_s14 + $0x98] sm:$0xff] }
 0x6e6   :  { %1260 = vmatpush.msra.mxu2 %v2995_v57 }
 0x6e7   :  { %1313 = vmatpush.msrb.mxu0 %v2986_v21  ;;  %v1395_v21 = vld [vmem:[%s3703_s14 + $0x80] sm:$0xff] }
 0x6e8   :  { %1261 = vmatpush.msra.mxu2 %v3004_v58 }
 0x6e9   :  { %1314 = vmatpush.msrb.mxu0 %v2995_v57  ;;  %v1396_v57 = vld [vmem:[%s3703_s14 + $0x88] sm:$0xff] }
 0x6ea   :  { %1262 = vmatpush.msra.mxu2 %v1193_v17 }
 0x6eb   :  { %1315 = vmatpush.msrb.mxu0 %v3004_v58  ;;  %v1394_v58 = vld [vmem:[%s3703_s14 + $0x78] sm:$0xff] }
 0x6ec   :  { %1263 = vmatpush.msra.mxu2 %v1192_v60 }
 0x6ed   :  { %1316 = vmatpush.msrb.mxu0 %v1193_v17  ;;  %v1389_v17 = vld [vmem:[%s3703_s14 + $0x50] sm:$0xff] }
 0x6ee   :  { %1264 = vmatpush.msra.mxu2 %v1191_v62 }
 0x6ef   :  { %1317 = vmatpush.msrb.mxu0 %v1192_v60  ;;  %v1390_v60 = vld [vmem:[%s3703_s14 + $0x58] sm:$0xff] }
 0x6f0   :  { %1265 = vmatpush.msra.mxu2 %v1190_v4 }
 0x6f1   :  { %1318 = vmatpush.msrb.mxu0 %v1191_v62  ;;  %v1388_v62 = vld [vmem:[%s3703_s14 + $0x48] sm:$0xff] }
 0x6f2   :  { %1266 = vmatpush.msra.mxu2 %v1189_v32 }
 0x6f3   :  { %1319 = vmatpush.msrb.mxu0 %v1190_v4  ;;  %v1386_v4 = vld [vmem:[%s3703_s14 + $0x38] sm:$0xff] }
 0x6f4   :  { %1267 = vmatpush.msra.mxu2 %v1188_v9 }
 0x6f5   :  { %1320 = vmatpush.msrb.mxu0 %v1189_v32  ;;  %v1383_v32 = vld [vmem:[%s3703_s14 + $0x20] sm:$0xff] }
 0x6f6   :  { %1268 = vmatpush.msra.mxu2 %v1187_v16 }
 0x6f7   :  { %1321 = vmatpush.msrb.mxu0 %v1188_v9  ;;  %v1382_v9 = vld [vmem:[%s3703_s14 + $0x18] sm:$0xff] }
 0x6f8   :  { %1411 = vmatpush.msrb.mxu2 %v1409_v43 }
 0x6f9   :  { %1322 = vmatpush.msrb.mxu0 %v1187_v16  ;;  %v3185_v16 = vld [vmem:[%s3704_s15 + $0xf8] sm:$0xff] }
 0x6fa   :  { %1412 = vmatpush.msrb.mxu2 %v1407_v44  ;;  %v3346_v44 = vld [vmem:[%s3704_s15 + $0x40] sm:$0xff] }
 0x6fc   :  { %1413 = vmatpush.msrb.mxu2 %v1405_v46  ;;  %v3358_v46 = vld [vmem:[%s3704_s15 + $0x30] sm:$0xff] }
 0x6fe   :  { %1414 = vmatpush.msrb.mxu2 %v1403_v49  ;;  %v3370_v49 = vld [vmem:[%s3704_s15 + $0x20] sm:$0xff] }
 0x700   :  { %1415 = vmatpush.msrb.mxu2 %v1401_v3  ;;  %v3382_v3 = vld [vmem:[%s3704_s15 + $0x10] sm:$0xff] }
 0x702   :  { %1416 = vmatpush.msrb.mxu2 %v1399_v19  ;;  %v1346_v19 = vpop.permute.xlu1 %1345 }
 0x704   :  { %1417 = vmatpush.msrb.mxu2 %v1397_v54 }
 0x706   :  { %1418 = vmatpush.msrb.mxu2 %v1395_v21  ;;  %v3396_v21 = vld [vmem:[%s3704_s15] sm:$0xff] }
 0x708   :  { %1419 = vmatpush.msrb.mxu2 %v1393_v22  ;;  %v3406_v22 = vld [vmem:[%s3704_s15 + $0x8] sm:$0xff] }
 0x70a   :  { %1420 = vmatpush.msrb.mxu2 %v1391_v61 }
 0x70c   :  { %1421 = vmatpush.msrb.mxu2 %v1389_v17 }
 0x75a   :  { %v1138_v27 = vpop.f32.mrf.mxu2 }
 0x75b   :  { %v1139_v48 = vadd.f32 %v1138_v27, %v1116_v59  ;;  %v1392_v59 = vld [vmem:[%s3703_s14 + $0x68] sm:$0xff]  ;;  %v1387_v27 = vld [vmem:[%s3703_s14 + $0x40] sm:$0xff] }
 0x75c   :  { %1422 = vmatpush.msrb.mxu2 %v1387_v27 }
 0x75d   :  { %v1144_v63 = vmax.f32 %v1139_v48, 0.0  ;;  %v1334_v48 = vld [vmem:[%s3701_s12] sm:$0xff] }
 0x75f   :  { %2166 = vmatmul.msk.f32.vlgmr.msrb.gmra.mxu3 %vm838_vm1, %v1144_v63  ;;  %v1385_v63 = vld [vmem:[%s3703_s14 + $0x30] sm:$0xff] }
 0x760   :  { %1434 = vmatpush.msrb.mxu3 %v1410_v35  ;;  %1423 = vmatpush.msrb.mxu2 %v1385_v63 }
 0x762   :  { %v1141_v10 = vpop.f32.mrf.mxu2  ;;  %1435 = vmatpush.msrb.mxu3 %v1408_v14  ;;  %1424 = vmatpush.msrb.mxu2 %v1383_v32 }
 0x763   :  { %v1142_v12 = vadd.f32 %v1141_v10, %v1119_v0  ;;  %v1381_v0 = vld [vmem:[%s3703_s14 + $0x10] sm:$0xff]  ;;  %v1379_v10 = vld [vmem:[%s3703_s14] sm:$0xff] }
 0x764   :  { %1436 = vmatpush.msrb.mxu3 %v1406_v47  ;;  %1425 = vmatpush.msrb.mxu2 %v1381_v0  ;;  %v3363_v47 = vld [vmem:[%s3704_s15 + $0x38] sm:$0xff] }
 0x765   :  { %v1145_v13 = vmax.f32 %v1142_v12, 0.0  ;;  %v1380_v12 = vld [vmem:[%s3703_s14 + $0x8] sm:$0xff] }
 0x766   :  { %1437 = vmatpush.msrb.mxu3 %v1404_v20  ;;  %1426 = vmatpush.msrb.mxu2 %v1379_v10  ;;  %v3375_v20 = vld [vmem:[%s3704_s15 + $0x28] sm:$0xff] }
 0x767   :  { %2167 = vmatmul.msk.f32.gmra.mxu3 %vm838_vm1, %v1145_v13  ;;  %v3180_v13 = vld [vmem:[%s3704_s15 + $0xf0] sm:$0xff] }
 0x768   :  { %1438 = vmatpush.msrb.mxu3 %v1402_v52  ;;  %v3387_v52 = vld [vmem:[%s3704_s15 + $0x18] sm:$0xff] }
 0x76a   :  { %1439 = vmatpush.msrb.mxu3 %v1400_v53 }
 0x76c   :  { %1440 = vmatpush.msrb.mxu3 %v1398_v55 }
 0x76e   :  { %1441 = vmatpush.msrb.mxu3 %v1396_v57  ;;  %v3401_v57 = vld [vmem:[%s3704_s15 + $0x100] sm:$0xff] }
 0x770   :  { %1442 = vmatpush.msrb.mxu3 %v1394_v58  ;;  %v3413_v58 = vld [vmem:[%s3704_s15 + $0x108] sm:$0xff] }
 0x772   :  { %1443 = vmatpush.msrb.mxu3 %v1392_v59 }
 0x774   :  { %1444 = vmatpush.msrb.mxu3 %v1390_v60 }
 0x776   :  { %1445 = vmatpush.msrb.mxu3 %v1388_v62 }
 0x778   :  { %1446 = vmatpush.msrb.mxu3 %v1386_v4 }
 0x77a   :  { %1447 = vmatpush.msrb.mxu3 %v1384_v7 }
 0x77c   :  { %1448 = vmatpush.msrb.mxu3 %v1382_v9 }
 0x77e   :  { %1449 = vmatpush.msrb.mxu3 %v1380_v12 }
 0x7e2   :  { %v3048_v18 = vpop.f32.mrf.mxu3 }
 0x7e3   :  { %1219 = vmatmul.f32.vlgmr.msra.gmra.mxu0 %v3048_v18 }
 0x7ea   :  { %v3051_v1 = vpop.f32.mrf.mxu3 }
 0x7eb   :  { %1222 = vmatmul.f32.gmra.mxu0 %v3051_v1 }
 0x860   :  { %v3054_v23 = vpop.f32.mrf.mxu0 }
 0x861   :  { %1242 = vmatmul.f32.vlgmr.msra.gmra.mxu1 %v3054_v23 }
 0x868   :  { %v3057_v40 = vpop.f32.mrf.mxu0 }
 0x869   :  { %1245 = vmatmul.f32.gmra.mxu1 %v3057_v40 }
 0x8de   :  { %v1243_v24 = vpop.f32.mrf.mxu1 }
 0x8df   :  { %v1249_v26 = vmul.f32 2.0, %v1243_v24  ;;  %v3214_v24 = vld [vmem:[%s3704_s15 + $0xc0] sm:$0xff] }
 0x8e1   :  { %v3061_v28 = vsub.f32 %v1249_v26, %v3048_v18  ;;  %v3219_v26 = vld [vmem:[%s3704_s15 + $0xc8] sm:$0xff] }
 0x8e3   :  { %1269 = vmatmul.f32.vlgmr.msra.gmra.mxu2 %v3061_v28 }
 0x8e4   :  { %1550 = vmatpush.msra.mxu2 %v3185_v16 }
 0x8e6   :  { %v1246_v29 = vpop.f32.mrf.mxu1 }
 0x8e7   :  { %v1250_v2 = vmul.f32 2.0, %v1246_v29  ;;  %v3231_v29 = vld [vmem:[%s3704_s15 + $0xb8] sm:$0xff] }
 0x8e9   :  { %v1252_v31 = vsub.f32 %v1250_v2, %v3051_v1  ;;  %v3238_v2 = vld [vmem:[%s3704_s15 + $0xa0] sm:$0xff] }
 0x8eb   :  { %1272 = vmatmul.f32.gmra.mxu2 %v1252_v31 }
 0x966   :  { %v1270_v8 = vpop.f32.mrf.mxu2 }
 0x967   :  { %v1276_v25 = vmul.f32 2.0, %v1270_v8  ;;  %v3248_v8 = vld [vmem:[%s3704_s15 + $0x130] sm:$0xff] }
 0x968   :  { %1539 = vmatpush.msra.mxu0 %v3248_v8 }
 0x969   :  { %v1278_v33 = vsub.f32 %v1276_v25, %v3054_v23  ;;  %v3255_v25 = vld [vmem:[%s3704_s15 + $0x138] sm:$0xff] }
 0x96b   :  { %1296 = vmatmul.f32.vlgmr.msra.gmra.mxu3 %v1278_v33 }
 0x96c   :  { %1585 = vmatpush.msra.mxu3 %v3255_v25 }
 0x96e   :  { %v1273_v50 = vpop.f32.mrf.mxu2 }
 0x96f   :  { %v1277_v34 = vmul.f32 2.0, %v1273_v50  ;;  %v3265_v50 = vld [vmem:[%s3704_s15 + $0x90] sm:$0xff] }
 0x971   :  { %v1279_v11 = vsub.f32 %v1277_v34, %v3057_v40  ;;  %v3270_v34 = vld [vmem:[%s3704_s15 + $0x98] sm:$0xff] }
 0x973   :  { %1299 = vmatmul.f32.gmra.mxu3 %v1279_v11 }
 0x9ee   :  { %v1297_v36 = vpop.f32.mrf.mxu3 }
 0x9ef   :  { %v1303_v30 = vmul.f32 2.0, %v1297_v36  ;;  %v3284_v36 = vld [vmem:[%s3704_s15 + $0x110] sm:$0xff] }
 0x9f1   :  { %v1305_v6 = vsub.f32 %v1303_v30, %v3061_v28  ;;  %v3289_v30 = vld [vmem:[%s3704_s15 + $0x118] sm:$0xff] }
 0x9f3   :  { %1323 = vmatmul.f32.vlgmr.msrb.gmra.mxu0 %v1305_v6 }
 0x9f6   :  { %v1300_v15 = vpop.f32.mrf.mxu3 }
 0x9f7   :  { %v1304_v51 = vmul.f32 2.0, %v1300_v15  ;;  %v3299_v15 = vld [vmem:[%s3704_s15 + $0x88] sm:$0xff] }
 0x9f9   :  { %v1306_v37 = vsub.f32 %v1304_v51, %v1252_v31  ;;  %v3308_v51 = vld [vmem:[%s3704_s15 + $0x70] sm:$0xff] }
 0x9fb   :  { %1326 = vmatmul.f32.gmra.mxu0 %v1306_v37 }
 0xa70   :  { %v1324_v38 = vpop.f32.mrf.mxu0 }
 0xa71   :  { %v1330_v41 = vmul.f32 2.0, %v1324_v38  ;;  %v3322_v38 = vld [vmem:[%s3704_s15 + $0x60] sm:$0xff] }
 0xa73   :  { %v1332_v45 = vsub.f32 %v1330_v41, %v1278_v33  ;;  %v3334_v41 = vld [vmem:[%s3704_s15 + $0x50] sm:$0xff] }
 0xa78   :  { %v1327_v39 = vpop.f32.mrf.mxu0 }
 0xa79   :  { %v1331_v56 = vmul.f32 2.0, %v1327_v39  ;;  %v3327_v39 = vld [vmem:[%s3704_s15 + $0x68] sm:$0xff] }
 0xa7b   :  { %v1333_v42 = vsub.f32 %v1331_v56, %v1279_v11  ;;  %v3339_v56 = vld [vmem:[%s3704_s15 + $0x58] sm:$0xff] }
 0xa7d   :  { %1358 = vmatpush.msrb.mxu1 %v1333_v42  ;;  %v1341_v42 = vpop.permute.xlu0 %1340 }
 0xa7f   :  { %1359 = vmatpush.msrb.mxu1 %v1332_v45  ;;  %v3351_v45 = vld [vmem:[%s3704_s15 + $0x48] sm:$0xff] }
 0xa81   :  { %1360 = vmatpush.msrb.mxu1 %v1306_v37  ;;  %v3313_v37 = vld [vmem:[%s3704_s15 + $0x78] sm:$0xff] }
 0xa83   :  { %1361 = vmatpush.msrb.mxu1 %v1305_v6  ;;  %v3294_v6 = vld [vmem:[%s3704_s15 + $0x80] sm:$0xff] }
 0xa85   :  { %1362 = vmatpush.msrb.mxu1 %v1279_v11  ;;  %v3277_v11 = vld [vmem:[%s3704_s15 + $0x128] sm:$0xff] }
 0xa86   :  { %1586 = vmatpush.msra.mxu3 %v3277_v11 }
 0xa87   :  { %1363 = vmatpush.msrb.mxu1 %v1278_v33  ;;  %v3260_v33 = vld [vmem:[%s3704_s15 + $0x120] sm:$0xff] }
 0xa88   :  { %1540 = vmatpush.msra.mxu0 %v3260_v33  ;;  %1587 = vmatpush.msra.mxu3 %v3289_v30 }
 0xa89   :  { %1364 = vmatpush.msrb.mxu1 %v1252_v31  ;;  %v3243_v31 = vld [vmem:[%s3704_s15 + $0xa8] sm:$0xff] }
 0xa8a   :  { %1541 = vmatpush.msra.mxu0 %v3284_v36  ;;  %1588 = vmatpush.msra.mxu3 %v3413_v58 }
 0xa8b   :  { %1365 = vmatpush.msrb.mxu1 %v3061_v28  ;;  %v3226_v28 = vld [vmem:[%s3704_s15 + $0xb0] sm:$0xff] }
 0xa8c   :  { %1542 = vmatpush.msra.mxu0 %v3401_v57 }
 0xa8d   :  { %1366 = vmatpush.msrb.mxu1 %v3057_v40  ;;  %v3207_v40 = vld [vmem:[%s3704_s15 + $0xd8] sm:$0xff] }
 0xa8e   :  { %1602 = vmatpush.msrb.mxu0 %v3180_v13 }
 0xa8f   :  { %1367 = vmatpush.msrb.mxu1 %v3054_v23  ;;  %v3202_v23 = vld [vmem:[%s3704_s15 + $0xd0] sm:$0xff] }
 0xa91   :  { %1368 = vmatpush.msrb.mxu1 %v3051_v1  ;;  %v3197_v1 = vld [vmem:[%s3704_s15 + $0xe8] sm:$0xff] }
 0xa92   :  { %1551 = vmatpush.msra.mxu2 %v3197_v1 }
 0xa93   :  { %1369 = vmatpush.msrb.mxu1 %v3048_v18  ;;  %v3190_v18 = vld [vmem:[%s3704_s15 + $0xe0] sm:$0xff] }
 0xa94   :  { %2168 = vmatmul.msk.f32.vlgmr.msrb.gmra.mxu1 %vm838_vm1, %v1334_v48  ;;  %1552 = vmatpush.msra.mxu2 %v3207_v40 }
 0xa95   :  { %1504 = vmatpush.msra.mxu1 %v3180_v13  ;;  %1603 = vmatpush.msrb.mxu0 %v3190_v18 }
 0xa96   :  { %1553 = vmatpush.msra.mxu2 %v3219_v26 }
 0xa97   :  { %1505 = vmatpush.msra.mxu1 %v3190_v18  ;;  %1604 = vmatpush.msrb.mxu0 %v3202_v23 }
 0xa98   :  { %1554 = vmatpush.msra.mxu2 %v3231_v29 }
 0xa99   :  { %1506 = vmatpush.msra.mxu1 %v3202_v23  ;;  %1605 = vmatpush.msrb.mxu0 %v3214_v24 }
 0xa9a   :  { %1555 = vmatpush.msra.mxu2 %v3243_v31 }
 0xa9b   :  { %1507 = vmatpush.msra.mxu1 %v3214_v24  ;;  %1606 = vmatpush.msrb.mxu0 %v3226_v28 }
 0xa9c   :  { %2169 = vmatmul.msk.f32.gmra.mxu1 %vm838_vm1, %v1335_v5  ;;  %1556 = vmatpush.msra.mxu2 %v3270_v34 }
 0xa9d   :  { %1508 = vmatpush.msra.mxu1 %v3226_v28  ;;  %1607 = vmatpush.msrb.mxu0 %v3238_v2 }
 0xa9e   :  { %1557 = vmatpush.msra.mxu2 %v3299_v15 }
 0xa9f   :  { %1509 = vmatpush.msra.mxu1 %v3238_v2  ;;  %1608 = vmatpush.msrb.mxu0 %v3265_v50 }
 0xaa0   :  { %1558 = vmatpush.msra.mxu2 %v3313_v37 }
 0xaa1   :  { %1510 = vmatpush.msra.mxu1 %v3265_v50  ;;  %1609 = vmatpush.msrb.mxu0 %v3294_v6 }
 0xaa2   :  { %1559 = vmatpush.msra.mxu2 %v3327_v39 }
 0xaa3   :  { %1511 = vmatpush.msra.mxu1 %v3294_v6  ;;  %1610 = vmatpush.msrb.mxu0 %v3308_v51 }
 0xaa4   :  { %1560 = vmatpush.msra.mxu2 %v3339_v56 }
 0xaa5   :  { %1512 = vmatpush.msra.mxu1 %v3308_v51  ;;  %1611 = vmatpush.msrb.mxu0 %v3322_v38 }
 0xaa6   :  { %1561 = vmatpush.msra.mxu2 %v3351_v45 }
 0xaa7   :  { %1513 = vmatpush.msra.mxu1 %v3322_v38  ;;  %1612 = vmatpush.msrb.mxu0 %v3334_v41 }
 0xaa8   :  { %1562 = vmatpush.msra.mxu2 %v3363_v47 }
 0xaa9   :  { %1514 = vmatpush.msra.mxu1 %v3334_v41  ;;  %1613 = vmatpush.msrb.mxu0 %v3346_v44 }
 0xaaa   :  { %1563 = vmatpush.msra.mxu2 %v3375_v20 }
 0xaab   :  { %1515 = vmatpush.msra.mxu1 %v3346_v44  ;;  %1614 = vmatpush.msrb.mxu0 %v3358_v46 }
 0xaac   :  { %1564 = vmatpush.msra.mxu2 %v3387_v52 }
 0xaad   :  { %1516 = vmatpush.msra.mxu1 %v3358_v46  ;;  %1615 = vmatpush.msrb.mxu0 %v3370_v49 }
 0xaae   :  { %1565 = vmatpush.msra.mxu2 %v3406_v22 }
 0xaaf   :  { %1517 = vmatpush.msra.mxu1 %v3370_v49  ;;  %1616 = vmatpush.msrb.mxu0 %v3382_v3 }
 0xab1   :  { %1518 = vmatpush.msra.mxu1 %v3382_v3  ;;  %1617 = vmatpush.msrb.mxu0 %v3396_v21 }
 0xab3   :  { %1519 = vmatpush.msra.mxu1 %v3396_v21 }
 0xab5   :  { %1648 = vmatpush.msrb.mxu1 %v3185_v16 }
 0xab7   :  { %1649 = vmatpush.msrb.mxu1 %v3197_v1 }
 0xab9   :  { %1650 = vmatpush.msrb.mxu1 %v3207_v40 }
 0xabb   :  { %1651 = vmatpush.msrb.mxu1 %v3219_v26 }
 0xabd   :  { %1652 = vmatpush.msrb.mxu1 %v3231_v29 }
 0xabf   :  { %1653 = vmatpush.msrb.mxu1 %v3243_v31 }
 0xac1   :  { %1654 = vmatpush.msrb.mxu1 %v3270_v34 }
 0xac3   :  { %1655 = vmatpush.msrb.mxu1 %v3299_v15 }
 0xac5   :  { %1656 = vmatpush.msrb.mxu1 %v3313_v37 }
 0xac7   :  { %1657 = vmatpush.msrb.mxu1 %v3327_v39 }
 0xac9   :  { %1658 = vmatpush.msrb.mxu1 %v3339_v56 }
 0xacb   :  { %1659 = vmatpush.msrb.mxu1 %v3351_v45 }
 0xacd   :  { %1660 = vmatpush.msrb.mxu1 %v3363_v47 }
 0xacf   :  { %1661 = vmatpush.msrb.mxu1 %v3375_v20 }
 0xad1   :  { %1662 = vmatpush.msrb.mxu1 %v3387_v52 }
 0xad3   :  { %1663 = vmatpush.msrb.mxu1 %v3406_v22 }
 0xb11   :  { %v1371_v43 = vpop.f32.mrf.mxu1 }
 0xb12   :  { %v1372_v35 = vadd.f32 %v1371_v43, %v1341_v42 }
 0xb14   :  { %v1377_v14 = vmax.f32 %v1372_v35, 0.0 }
 0xb16   :  { %1427 = vmatmul.f32.vlgmr.msrb.gmra.mxu2 %v1377_v14  ;;  %1450 = vmatmul.f32.vlgmr.msrb.gmra.mxu3 %v1377_v14 }
 0xb17   :  { %1637 = vmatpush.msrb.mxu3 %v3248_v8  ;;  %1683 = vmatpush.msrb.mxu2 %v3255_v25 }
 0xb19   :  { %v1374_v53 = vpop.f32.mrf.mxu1  ;;  %1638 = vmatpush.msrb.mxu3 %v3260_v33  ;;  %1684 = vmatpush.msrb.mxu2 %v3277_v11 }
 0xb1a   :  { %v1375_v54 = vadd.f32 %v1374_v53, %v1346_v19 }
 0xb1b   :  { %1639 = vmatpush.msrb.mxu3 %v3284_v36  ;;  %1685 = vmatpush.msrb.mxu2 %v3289_v30 }
 0xb1c   :  { %v1378_v55 = vmax.f32 %v1375_v54, 0.0 }
 0xb1d   :  { %1640 = vmatpush.msrb.mxu3 %v3401_v57  ;;  %1686 = vmatpush.msrb.mxu2 %v3413_v58 }
 0xb1e   :  { %1430 = vmatmul.f32.gmra.mxu2 %v1378_v55  ;;  %1453 = vmatmul.f32.gmra.mxu3 %v1378_v55 }
 0xb99   :  { %v3455_v61 = vpop.f32.mrf.mxu2  ;;  %v3457_v59 = vpop.f32.mrf.mxu3 }
 0xb9a   :  { %1520 = vmatmul.f32.vlgmr.msra.gmra.mxu1 %v3455_v61  ;;  %2170 = vmatmul.msk.f32.vlgmr.msra.gmra.mxu0 %vm1497_vm2, %v3457_v59 }
 0xb9b   :  { %1566 = vmatmul.f32.vlgmr.msra.gmra.mxu2 %v3455_v61  ;;  %2172 = vmatmul.msk.f32.vlgmr.msra.gmra.mxu3 %vm1497_vm2, %v3457_v59 }
 0xb9c   :  { %1708 = vmatpush.msra.mxu3 %v3180_v13  ;;  %1754 = vmatpush.msra.mxu2 %v3185_v16 }
 0xb9d   :  { %1743 = vmatpush.msra.mxu0 %v3248_v8  ;;  %1789 = vmatpush.msra.mxu1 %v3255_v25 }
 0xb9e   :  { %1709 = vmatpush.msra.mxu3 %v3190_v18  ;;  %1755 = vmatpush.msra.mxu2 %v3197_v1 }
 0xb9f   :  { %1744 = vmatpush.msra.mxu0 %v3260_v33  ;;  %1790 = vmatpush.msra.mxu1 %v3277_v11 }
 0xba0   :  { %1710 = vmatpush.msra.mxu3 %v3202_v23  ;;  %1756 = vmatpush.msra.mxu2 %v3207_v40 }
 0xba1   :  { %v3477_v17 = vpop.f32.mrf.mxu2  ;;  %v3479_v60 = vpop.f32.mrf.mxu3  ;;  %1745 = vmatpush.msra.mxu0 %v3284_v36  ;;  %1791 = vmatpush.msra.mxu1 %v3289_v30 }
 0xba2   :  { %1523 = vmatmul.f32.gmra.mxu1 %v3477_v17  ;;  %2171 = vmatmul.msk.f32.gmra.mxu0 %vm1497_vm2, %v3479_v60 }
 0xba3   :  { %1569 = vmatmul.f32.gmra.mxu2 %v3477_v17  ;;  %2173 = vmatmul.msk.f32.gmra.mxu3 %vm1497_vm2, %v3479_v60 }
 0xba4   :  { %1711 = vmatpush.msra.mxu3 %v3214_v24  ;;  %1757 = vmatpush.msra.mxu2 %v3219_v26 }
 0xba5   :  { %1746 = vmatpush.msra.mxu0 %v3401_v57  ;;  %1792 = vmatpush.msra.mxu1 %v3413_v58 }
 0xba6   :  { %1712 = vmatpush.msra.mxu3 %v3226_v28  ;;  %1758 = vmatpush.msra.mxu2 %v3231_v29 }
 0xba8   :  { %1713 = vmatpush.msra.mxu3 %v3238_v2  ;;  %1759 = vmatpush.msra.mxu2 %v3243_v31 }
 0xbaa   :  { %1714 = vmatpush.msra.mxu3 %v3265_v50  ;;  %1760 = vmatpush.msra.mxu2 %v3270_v34 }
 0xbac   :  { %1715 = vmatpush.msra.mxu3 %v3294_v6  ;;  %1761 = vmatpush.msra.mxu2 %v3299_v15 }
 0xbae   :  { %1716 = vmatpush.msra.mxu3 %v3308_v51  ;;  %1762 = vmatpush.msra.mxu2 %v3313_v37 }
 0xbb0   :  { %1717 = vmatpush.msra.mxu3 %v3322_v38  ;;  %1763 = vmatpush.msra.mxu2 %v3327_v39 }
 0xbb2   :  { %1718 = vmatpush.msra.mxu3 %v3334_v41  ;;  %1764 = vmatpush.msra.mxu2 %v3339_v56 }
 0xbb4   :  { %1719 = vmatpush.msra.mxu3 %v3346_v44  ;;  %1765 = vmatpush.msra.mxu2 %v3351_v45 }
 0xbb6   :  { %1720 = vmatpush.msra.mxu3 %v3358_v46  ;;  %1766 = vmatpush.msra.mxu2 %v3363_v47 }
 0xbb8   :  { %1721 = vmatpush.msra.mxu3 %v3370_v49  ;;  %1767 = vmatpush.msra.mxu2 %v3375_v20 }
 0xbba   :  { %1722 = vmatpush.msra.mxu3 %v3382_v3  ;;  %1768 = vmatpush.msra.mxu2 %v3387_v52 }
 0xbbc   :  { %1723 = vmatpush.msra.mxu3 %v3396_v21  ;;  %1769 = vmatpush.msra.mxu2 %v3406_v22 }
 0xc17   :  { %v1521_v27 = vpop.f32.mrf.mxu1  ;;  %v1544_v48 = vpop.f32.mrf.mxu0 }
 0xc18   :  { %v3517_v62 = vadd.f32 %v1544_v48, %v1521_v27 }
 0xc1a   :  { %1618 = vmatmul.f32.vlgmr.msrb.gmra.mxu0 %v3517_v62  ;;  %1664 = vmatmul.f32.vlgmr.msrb.gmra.mxu1 %v3517_v62 }
 0xc1b   :  { %1814 = vmatpush.msrb.mxu0 %v3180_v13  ;;  %1860 = vmatpush.msrb.mxu1 %v3185_v16 }
 0xc1d   :  { %1815 = vmatpush.msrb.mxu0 %v3190_v18  ;;  %1861 = vmatpush.msrb.mxu1 %v3197_v1 }
 0xc1e   :  { %v1567_v63 = vpop.f32.mrf.mxu2  ;;  %v1590_v4 = vpop.f32.mrf.mxu3 }
 0xc1f   :  { %v3525_v5 = vadd.f32 %v1590_v4, %v1567_v63  ;;  %v1524_v32 = vpop.f32.mrf.mxu1  ;;  %v1547_v7 = vpop.f32.mrf.mxu0  ;;  %1816 = vmatpush.msrb.mxu0 %v3202_v23  ;;  %1862 = vmatpush.msrb.mxu1 %v3207_v40 }
 0xc20   :  { %v3529_v0 = vadd.f32 %v1547_v7, %v1524_v32 }
 0xc21   :  { %2174 = vmatmul.msk.f32.vlgmr.msrb.gmra.mxu3 %vm1497_vm2, %v3525_v5  ;;  %2176 = vmatmul.msk.f32.vlgmr.msrb.gmra.mxu2 %vm1497_vm2, %v3525_v5 }
 0xc22   :  { %1621 = vmatmul.f32.gmra.mxu0 %v3529_v0  ;;  %1667 = vmatmul.f32.gmra.mxu1 %v3529_v0 }
 0xc23   :  { %1817 = vmatpush.msrb.mxu0 %v3214_v24  ;;  %1863 = vmatpush.msrb.mxu1 %v3219_v26 }
 0xc24   :  { %1849 = vmatpush.msrb.mxu3 %v3248_v8  ;;  %1895 = vmatpush.msrb.mxu2 %v3255_v25 }
 0xc25   :  { %1818 = vmatpush.msrb.mxu0 %v3226_v28  ;;  %1864 = vmatpush.msrb.mxu1 %v3231_v29 }
 0xc26   :  { %v1570_v9 = vpop.f32.mrf.mxu2  ;;  %v1593_v10 = vpop.f32.mrf.mxu3  ;;  %1850 = vmatpush.msrb.mxu3 %v3260_v33  ;;  %1896 = vmatpush.msrb.mxu2 %v3277_v11 }
 0xc27   :  { %v3545_v12 = vadd.f32 %v1593_v10, %v1570_v9  ;;  %1819 = vmatpush.msrb.mxu0 %v3238_v2  ;;  %1865 = vmatpush.msrb.mxu1 %v3243_v31 }
 0xc28   :  { %1851 = vmatpush.msrb.mxu3 %v3284_v36  ;;  %1897 = vmatpush.msrb.mxu2 %v3289_v30 }
 0xc29   :  { %2175 = vmatmul.msk.f32.gmra.mxu3 %vm1497_vm2, %v3545_v12  ;;  %2177 = vmatmul.msk.f32.gmra.mxu2 %vm1497_vm2, %v3545_v12 }
 0xc2a   :  { %1820 = vmatpush.msrb.mxu0 %v3265_v50  ;;  %1866 = vmatpush.msrb.mxu1 %v3270_v34 }
 0xc2b   :  { %1852 = vmatpush.msrb.mxu3 %v3401_v57  ;;  %1898 = vmatpush.msrb.mxu2 %v3413_v58 }
 0xc2c   :  { %1821 = vmatpush.msrb.mxu0 %v3294_v6  ;;  %1867 = vmatpush.msrb.mxu1 %v3299_v15 }
 0xc2e   :  { %1822 = vmatpush.msrb.mxu0 %v3308_v51  ;;  %1868 = vmatpush.msrb.mxu1 %v3313_v37 }
 0xc30   :  { %1823 = vmatpush.msrb.mxu0 %v3322_v38  ;;  %1869 = vmatpush.msrb.mxu1 %v3327_v39 }
 0xc32   :  { %1824 = vmatpush.msrb.mxu0 %v3334_v41  ;;  %1870 = vmatpush.msrb.mxu1 %v3339_v56 }
 0xc34   :  { %1825 = vmatpush.msrb.mxu0 %v3346_v44  ;;  %1871 = vmatpush.msrb.mxu1 %v3351_v45 }
 0xc36   :  { %1826 = vmatpush.msrb.mxu0 %v3358_v46  ;;  %1872 = vmatpush.msrb.mxu1 %v3363_v47 }
 0xc38   :  { %1827 = vmatpush.msrb.mxu0 %v3370_v49  ;;  %1873 = vmatpush.msrb.mxu1 %v3375_v20 }
 0xc3a   :  { %1828 = vmatpush.msrb.mxu0 %v3382_v3  ;;  %1874 = vmatpush.msrb.mxu1 %v3387_v52 }
 0xc3c   :  { %1829 = vmatpush.msrb.mxu0 %v3396_v21  ;;  %1875 = vmatpush.msrb.mxu1 %v3406_v22 }
 0xc97   :  { %v1619_v42 = vpop.f32.mrf.mxu0  ;;  %v1665_v43 = vpop.f32.mrf.mxu1 }
 0xc9f   :  { %v1622_v63 = vpop.f32.mrf.mxu0  ;;  %v1668_v4 = vpop.f32.mrf.mxu1 }
 0xca4   :  { %v1642_v35 = vpop.f32.mrf.mxu3  ;;  %v1688_v14 = vpop.f32.mrf.mxu2 }
 0xca5   :  { %v1643_v19 = vadd.f32 %v1642_v35, %v1619_v42  ;;  %v1689_v53 = vadd.f32 %v1688_v14, %v1665_v43 }
 0xca7   :  { %v1694_v54 = vmul.f32 2.0, %v1643_v19  ;;  %v1695_v55 = vmul.f32 2.0, %v1689_v53 }
 0xca9   :  { %v3578_v27 = vsub.f32 %v1694_v54, %v3455_v61  ;;  %v3581_v48 = vsub.f32 %v1695_v55, %v3457_v59 }
 0xcab   :  { %1724 = vmatmul.f32.vlgmr.msra.gmra.mxu3 %v3578_v27  ;;  %2178 = vmatmul.msk.f32.vlgmr.msra.gmra.mxu0 %vm1497_vm2, %v3581_v48 }
 0xcac   :  { %1770 = vmatmul.f32.vlgmr.msra.gmra.mxu2 %v3578_v27  ;;  %2180 = vmatmul.msk.f32.vlgmr.msra.gmra.mxu1 %vm1497_vm2, %v3581_v48  ;;  %v1645_v32 = vpop.f32.mrf.mxu3  ;;  %v1691_v7 = vpop.f32.mrf.mxu2 }
 0xcad   :  { %v1646_v9 = vadd.f32 %v1645_v32, %v1622_v63  ;;  %v1692_v10 = vadd.f32 %v1691_v7, %v1668_v4  ;;  %1920 = vmatpush.msra.mxu3 %v3180_v13  ;;  %1966 = vmatpush.msra.mxu2 %v3185_v16 }
 0xcae   :  { %1955 = vmatpush.msra.mxu0 %v3248_v8  ;;  %2001 = vmatpush.msra.mxu1 %v3255_v25 }
 0xcaf   :  { %v1696_v42 = vmul.f32 2.0, %v1646_v9  ;;  %v1697_v43 = vmul.f32 2.0, %v1692_v10  ;;  %1921 = vmatpush.msra.mxu3 %v3190_v18  ;;  %1967 = vmatpush.msra.mxu2 %v3197_v1 }
 0xcb0   :  { %1956 = vmatpush.msra.mxu0 %v3260_v33  ;;  %2002 = vmatpush.msra.mxu1 %v3277_v11 }
 0xcb1   :  { %v3598_v35 = vsub.f32 %v1696_v42, %v3477_v17  ;;  %v3601_v13 = vsub.f32 %v1697_v43, %v3479_v60  ;;  %1922 = vmatpush.msra.mxu3 %v3202_v23  ;;  %1968 = vmatpush.msra.mxu2 %v3207_v40 }
 0xcb2   :  { %1957 = vmatpush.msra.mxu0 %v3284_v36  ;;  %2003 = vmatpush.msra.mxu1 %v3289_v30 }
 0xcb3   :  { %1727 = vmatmul.f32.gmra.mxu3 %v3598_v35  ;;  %2179 = vmatmul.msk.f32.gmra.mxu0 %vm1497_vm2, %v3601_v13 }
 0xcb4   :  { %1773 = vmatmul.f32.gmra.mxu2 %v3598_v35  ;;  %2181 = vmatmul.msk.f32.gmra.mxu1 %vm1497_vm2, %v3601_v13 }
 0xcb5   :  { %1923 = vmatpush.msra.mxu3 %v3214_v24  ;;  %1969 = vmatpush.msra.mxu2 %v3219_v26 }
 0xcb6   :  { %1958 = vmatpush.msra.mxu0 %v3401_v57  ;;  %2004 = vmatpush.msra.mxu1 %v3413_v58 }
 0xcb7   :  { %1924 = vmatpush.msra.mxu3 %v3226_v28  ;;  %1970 = vmatpush.msra.mxu2 %v3231_v29 }
 0xcb9   :  { %1925 = vmatpush.msra.mxu3 %v3238_v2  ;;  %1971 = vmatpush.msra.mxu2 %v3243_v31 }
 0xcbb   :  { %1926 = vmatpush.msra.mxu3 %v3265_v50  ;;  %1972 = vmatpush.msra.mxu2 %v3270_v34 }
 0xcbd   :  { %1927 = vmatpush.msra.mxu3 %v3294_v6  ;;  %1973 = vmatpush.msra.mxu2 %v3299_v15 }
 0xcbf   :  { %1928 = vmatpush.msra.mxu3 %v3308_v51  ;;  %1974 = vmatpush.msra.mxu2 %v3313_v37 }
 0xcc1   :  { %1929 = vmatpush.msra.mxu3 %v3322_v38  ;;  %1975 = vmatpush.msra.mxu2 %v3327_v39 }
 0xcc3   :  { %1930 = vmatpush.msra.mxu3 %v3334_v41  ;;  %1976 = vmatpush.msra.mxu2 %v3339_v56 }
 0xcc5   :  { %1931 = vmatpush.msra.mxu3 %v3346_v44  ;;  %1977 = vmatpush.msra.mxu2 %v3351_v45 }
 0xcc7   :  { %1932 = vmatpush.msra.mxu3 %v3358_v46  ;;  %1978 = vmatpush.msra.mxu2 %v3363_v47 }
 0xcc9   :  { %1933 = vmatpush.msra.mxu3 %v3370_v49  ;;  %1979 = vmatpush.msra.mxu2 %v3375_v20 }
 0xccb   :  { %1934 = vmatpush.msra.mxu3 %v3382_v3  ;;  %1980 = vmatpush.msra.mxu2 %v3387_v52 }
 0xccd   :  { %1935 = vmatpush.msra.mxu3 %v3396_v21  ;;  %1981 = vmatpush.msra.mxu2 %v3406_v22 }
 0xd28   :  { %v1748_v16 = vpop.f32.mrf.mxu0 }
 0xd29   :  { %v1794_v18 = vpop.f32.mrf.mxu1 }
 0xd2e   :  { %v1725_v1 = vpop.f32.mrf.mxu3 }
 0xd2f   :  { %v1749_v23 = vadd.f32 %v1748_v16, %v1725_v1  ;;  %v1771_v40 = vpop.f32.mrf.mxu2 }
 0xd30   :  { %v1795_v24 = vadd.f32 %v1794_v18, %v1771_v40  ;;  %v1751_v31 = vpop.f32.mrf.mxu0 }
 0xd31   :  { %v1800_v26 = vmul.f32 2.0, %v1749_v23  ;;  %v1797_v25 = vpop.f32.mrf.mxu1 }
 0xd32   :  { %v1801_v28 = vmul.f32 2.0, %v1795_v24 }
 0xd33   :  { %v3642_v29 = vsub.f32 %v1800_v26, %v3517_v62 }
 0xd34   :  { %v3645_v2 = vsub.f32 %v1801_v28, %v3525_v5 }
 0xd35   :  { %1830 = vmatmul.f32.vlgmr.msrb.gmra.mxu0 %v3642_v29  ;;  %1876 = vmatmul.f32.vlgmr.msrb.gmra.mxu1 %v3642_v29 }
 0xd36   :  { %2182 = vmatmul.msk.f32.vlgmr.msrb.gmra.mxu3 %vm1497_vm2, %v3645_v2  ;;  %2184 = vmatmul.msk.f32.vlgmr.msrb.gmra.mxu2 %vm1497_vm2, %v3645_v2  ;;  %v1728_v8 = vpop.f32.mrf.mxu3 }
 0xd37   :  { %v1752_v33 = vadd.f32 %v1751_v31, %v1728_v8  ;;  %v1774_v50 = vpop.f32.mrf.mxu2 }
 0xd38   :  { %v1798_v34 = vadd.f32 %v1797_v25, %v1774_v50 }
 0xd39   :  { %v1802_v11 = vmul.f32 2.0, %v1752_v33 }
 0xd3a   :  { %v1803_v36 = vmul.f32 2.0, %v1798_v34 }
 0xd3b   :  { %v1806_v30 = vsub.f32 %v1802_v11, %v3529_v0 }
 0xd3c   :  { %v1807_v6 = vsub.f32 %v1803_v36, %v3545_v12 }
 0xd3d   :  { %1833 = vmatmul.f32.gmra.mxu0 %v1806_v30  ;;  %1879 = vmatmul.f32.gmra.mxu1 %v1806_v30 }
 0xd3e   :  { %2183 = vmatmul.msk.f32.gmra.mxu3 %vm1497_vm2, %v1807_v6  ;;  %2185 = vmatmul.msk.f32.gmra.mxu2 %vm1497_vm2, %v1807_v6 }
 0xdb2   :  { %v1831_v15 = vpop.f32.mrf.mxu0  ;;  %v1877_v51 = vpop.f32.mrf.mxu1 }
 0xdb9   :  { %v1854_v37 = vpop.f32.mrf.mxu3  ;;  %v1900_v38 = vpop.f32.mrf.mxu2 }
 0xdba   :  { %v1855_v39 = vadd.f32 %v1854_v37, %v1831_v15  ;;  %v1901_v41 = vadd.f32 %v1900_v38, %v1877_v51  ;;  %v1834_v47 = vpop.f32.mrf.mxu0  ;;  %v1880_v49 = vpop.f32.mrf.mxu1 }
 0xdbc   :  { %v1906_v56 = vmul.f32 2.0, %v1855_v39  ;;  %v1907_v44 = vmul.f32 2.0, %v1901_v41 }
 0xdbe   :  { %v1910_v45 = vsub.f32 %v1906_v56, %v3578_v27  ;;  %v1911_v46 = vsub.f32 %v1907_v44, %v3581_v48 }
 0xdc0   :  { %1936 = vmatmul.f32.vlgmr.msra.gmra.mxu3 %v1910_v45  ;;  %2186 = vmatmul.msk.f32.vlgmr.msra.gmra.mxu0 %vm1497_vm2, %v1911_v46 }
 0xdc1   :  { %1982 = vmatmul.f32.vlgmr.msra.gmra.mxu2 %v1910_v45  ;;  %2188 = vmatmul.msk.f32.vlgmr.msra.gmra.mxu1 %vm1497_vm2, %v1911_v46  ;;  %v1857_v20 = vpop.f32.mrf.mxu3  ;;  %v1903_v3 = vpop.f32.mrf.mxu2 }
 0xdc2   :  { %v1858_v52 = vadd.f32 %v1857_v20, %v1834_v47  ;;  %v1904_v21 = vadd.f32 %v1903_v3, %v1880_v49 }
 0xdc4   :  { %v1908_v57 = vmul.f32 2.0, %v1858_v52  ;;  %v1909_v22 = vmul.f32 2.0, %v1904_v21 }
 0xdc6   :  { %v1912_v58 = vsub.f32 %v1908_v57, %v3598_v35  ;;  %v1913_v14 = vsub.f32 %v1909_v22, %v3601_v13 }
 0xdc8   :  { %1939 = vmatmul.f32.gmra.mxu3 %v1912_v58  ;;  %2187 = vmatmul.msk.f32.gmra.mxu0 %vm1497_vm2, %v1913_v14 }
 0xdc9   :  { %1985 = vmatmul.f32.gmra.mxu2 %v1912_v58  ;;  %2189 = vmatmul.msk.f32.gmra.mxu1 %vm1497_vm2, %v1913_v14 }
 0xe3d   :  { %v1960_v19 = vpop.f32.mrf.mxu0 }
 0xe3e   :  { %v2006_v53 = vpop.f32.mrf.mxu1 }
 0xe43   :  { %v1937_v54 = vpop.f32.mrf.mxu3 }
 0xe44   :  { %v1983_v55 = vpop.f32.mrf.mxu2  ;;  %v1961_v63 = vadd.f32 %v1960_v19, %v1937_v54 }
 0xe45   :  { %v2007_v4 = vadd.f32 %v2006_v53, %v1983_v55  ;;  %v1963_v32 = vpop.f32.mrf.mxu0 }
 0xe46   :  { %v2009_v9 = vpop.f32.mrf.mxu1  ;;  %v2012_v16 = vmul.f32 2.0, %v1961_v63 }
 0xe47   :  { %v2013_v1 = vmul.f32 2.0, %v2007_v4 }
 0xe48   :  { %v2016_v26 = vsub.f32 %v2012_v16, %v3642_v29 }
 0xe49   :  { %v2017_v28 = vsub.f32 %v2013_v1, %v3645_v2 }
 0xe4b   :  { %v1940_v7 = vpop.f32.mrf.mxu3 }
 0xe4c   :  { %v1964_v10 = vadd.f32 %v1963_v32, %v1940_v7  ;;  %v1986_v42 = vpop.f32.mrf.mxu2 }
 0xe4d   :  { %v2010_v43 = vadd.f32 %v2009_v9, %v1986_v42 }
 0xe4e   :  { %v2014_v18 = vmul.f32 2.0, %v1964_v10 }
 0xe4f   :  { %v2015_v23 = vmul.f32 2.0, %v2010_v43 }
 0xe50   :  { %v2018_v40 = vsub.f32 %v2014_v18, %v1806_v30 }
 0xe51   :  { %v2019_v24 = vsub.f32 %v2015_v23, %v1807_v6 }
 0xe52   :  { %2034 = vmatpush.msrb.mxu0 %v2018_v40 }
 0xe53   :  { %2054 = vmatpush.msrb.mxu3 %v2019_v24 }
 0xe54   :  { %2035 = vmatpush.msrb.mxu0 %v2016_v26 }
 0xe55   :  { %2055 = vmatpush.msrb.mxu3 %v2017_v28 }
 0xe56   :  { %2036 = vmatpush.msrb.mxu0 %v1912_v58 }
 0xe57   :  { %2056 = vmatpush.msrb.mxu3 %v1913_v14 }
 0xe58   :  { %2037 = vmatpush.msrb.mxu0 %v1910_v45 }
 0xe59   :  { %2057 = vmatpush.msrb.mxu3 %v1911_v46 }
 0xe5a   :  { %2038 = vmatpush.msrb.mxu0 %v1806_v30 }
 0xe5b   :  { %2058 = vmatpush.msrb.mxu3 %v1807_v6 }
 0xe5c   :  { %2039 = vmatpush.msrb.mxu0 %v3642_v29 }
 0xe5d   :  { %2059 = vmatpush.msrb.mxu3 %v3645_v2 }
 0xe5e   :  { %2040 = vmatpush.msrb.mxu0 %v3598_v35  ;;  %v2020_v35 = vld [vmem:[%s3705_s16] sm:$0x7] }
 0xe5f   :  { %2060 = vmatpush.msrb.mxu3 %v3601_v13 }
 0xe60   :  { %2041 = vmatpush.msrb.mxu0 %v3578_v27 }
 0xe61   :  { %2061 = vmatpush.msrb.mxu3 %v3581_v48 }
 0xe62   :  { %2042 = vmatpush.msrb.mxu0 %v3529_v0  ;;  %v2025_v0 = vpop.permute.xlu2 %2024 }
 0xe63   :  { %2062 = vmatpush.msrb.mxu3 %v3545_v12 }
 0xe64   :  { %2043 = vmatpush.msrb.mxu0 %v3517_v62 }
 0xe65   :  { %2063 = vmatpush.msrb.mxu3 %v3525_v5 }
 0xe66   :  { %2044 = vmatpush.msrb.mxu0 %v3477_v17 }
 0xe67   :  { %2064 = vmatpush.msrb.mxu3 %v3479_v60 }
 0xe68   :  { %2045 = vmatpush.msrb.mxu0 %v3455_v61 }
 0xe69   :  { %2065 = vmatpush.msrb.mxu3 %v3457_v59  ;;  %2190 = vmatmul.msk.f32.vlgmr.msrb.gmra.mxu0 %vm838_vm1, %v2020_v35 }
 0xe6a   :  { %2191 = vmatmul.msk.f32.vlgmr.msrb.gmra.mxu3 %vm838_vm1, %v2020_v35 }
 0xee6   :  { %v2047_v62 = vpop.f32.mrf.mxu0 }
 0xee7   :  { %v2048_v61 = vadd.f32 %v2047_v62, %v2025_v0 }
 0xeed   :  { %v2067_v12 = vpop.f32.mrf.mxu3 }
 0xeee   :  { %v2068_v17 = vadd.f32 %v2067_v12, %v2025_v0 }
 0xef0   :  { %v2072_v60 = vrot.slane %v2068_v17, 4 }
 0xef2   :  { %v2074_v59 = vsel %vm2073_vm5, %v2048_v61, %v2072_v60 }
 0xef3   :  { %2079 = vst.msk [vmem:[#allocation16] sm:$0x77] %vm2078_vm6, %v2074_v59 }
 0xef4   :  { %2090 = dma.vmem_to_hbm [thread:$0]  %s2086_s5, 128, %s2088_s23, [#allocation4]  }
 0xef5   :  { %2423 = dma.done.wait [#allocation4], 128  }
 0xef6   :  { %2424 = vsyncadd [#allocation4], 4294967168 }
 0xef7   :  { %2095 = vsyncpa [#allocation3], 1 }
 0xef8   :  { %2096 = vsyncpa [#allocation8], 1 }
 0xef9   :  { %2097 = vsyncpa [#allocation11], 1 }
 0xefa   :  { %2098 = vsyncpa [#allocation14], 1 }
 0xefb   :  { %2099 = vsyncpa [#allocation4], 1 }
 0xefc   :  { %2100 = vsyncpa [#allocation5], 1 }

</bundles_post_ra>
